<compile_context>
chip_gen: v7x
topology: tpu7x:2x2x1
jax: 0.10.0
libtpu: 0.0.40
codegen_flags: <defaults>
</compile_context>

<pallas_src>
import math

import jax
import jax.numpy as jnp
from jax.experimental import pallas as pl
from jax.experimental.pallas import tpu as pltpu

TEXT_SIZE = 32          # `text_size` global in the reference module (synthetic choice)
SEED_SIZE = 256         # `seed_size` in the reference module
LAYERS = 1
NEG_SLOPE = 0.01        # nn.LeakyReLU default
NEG_SLOPE_SQ = NEG_SLOPE * NEG_SLOPE
BN_EPS = 1e-5
BN_SCALE = float(1.0 / math.sqrt(1.0 + BN_EPS))   # eval-mode BatchNorm scale
MAX_TB = 128            # batch tile: 128 fills v5e MXU rows (use 256 on v6e/v7x)


def _round_up(x, m):
    return (x + m - 1) // m * m


# ------------------------------ Pallas kernel -------------------------------

def _generator_kernel(x_ref, win_ref, wmid_ref, wout_ref, b_ref, o_ref):
    """Fully fused Generator forward: 4 MXU matmuls + VPU/EUP epilogues."""
    leaky = lambda v: jnp.where(v >= 0.0, v, NEG_SLOPE * v)
    leaky2 = lambda v: jnp.where(v >= 0.0, v, NEG_SLOPE_SQ * v)   # leaky∘leaky

    x = x_ref[...].astype(jnp.bfloat16)                           # (TB, 288)

    # text_in / seed_in Linear+BN (block-diagonal weight) + LeakyReLU, fused
    # with the LeakyReLU at the head of `lin` (leaky∘leaky).
    ts = jnp.dot(x, win_ref[...], preferred_element_type=jnp.float32)
    ts = leaky2(ts + b_ref[:, 0:768])                             # (TB, 768)

    # lin Linear(768->512)+BN; columns were pre-permuted so the result is the
    # flattened 2x2x128 map in (position*128 + channel) order.
    h = jnp.dot(ts.astype(jnp.bfloat16), wmid_ref[...],
                preferred_element_type=jnp.float32)
    h = leaky(h + b_ref[:, 768:1280])                             # (TB, 512)

    # cnn_list[0]: 3x3 reflect-pad conv + BN on the 2x2 map, pre-folded into a
    # single (512, 512) block matrix.
    h2 = leaky(jnp.dot(h.astype(jnp.bfloat16), wout_ref[:, 0:512],
                       preferred_element_type=jnp.float32))       # (TB, 512)

    # image_out 1x1 conv (clamped) + BN + bilinear 2x upsample (align_corners),
    # pre-folded into (512, 128) (48 real cols).  (tanh(z)+1)/2 == sigmoid(2z);
    # the factor 2 is folded into the weights, so just apply the sigmoid.
    img = jnp.dot(h2.astype(jnp.bfloat16), wout_ref[:, 512:640],
                  preferred_element_type=jnp.float32)             # (TB, 128)
    o_ref[...] = 1.0 / (1.0 + jnp.exp(-img))                      # sigmoid, lane-dense


def generator_forward(weights, text, seed, trans_level):
    del trans_level                                   # transitioning=False path
    B = text.shape[0]
    xin = jnp.concatenate([text, seed], axis=-1)      # (B, 288)
    TB = min(MAX_TB, _round_up(B, 8))
    B_pad = _round_up(B, TB)
    if B_pad != B:
        xin = jnp.pad(xin, ((0, B_pad - B), (0, 0)))

    def wspec(shape):
        return pl.BlockSpec(shape, lambda i: (0, 0))  # weights: VMEM-resident

    out = pl.pallas_call(
        _generator_kernel,
        out_shape=jax.ShapeDtypeStruct((B_pad, 128), jnp.float32),
        grid_spec=pltpu.PrefetchScalarGridSpec(
            num_scalar_prefetch=0,
            grid=(B_pad // TB,),
            in_specs=[
                pl.BlockSpec((TB, 288), lambda i: (i, 0)),        # activations
                wspec((288, 768)),                                # w_in
                wspec((768, 512)),                                # w_mid
                wspec((512, 640)),                                # w_out
                wspec((1, 1280)),                                 # bias row
            ],
            out_specs=pl.BlockSpec((TB, 128), lambda i: (i, 0)),
        ),
        compiler_params=pltpu.CompilerParams(
            dimension_semantics=("parallel",)),
    )(xin, weights["w_in"], weights["w_mid"], weights["w_out"], weights["bias"])

    side = 2 ** (LAYERS + 1)                          # 4
    return out[:B, :side * side * 3].reshape(B, side, side, 3)   # NHWC


# ------------------------- host-side parameter prep -------------------------

def _xavier_normal(key, shape):
    """torch.nn.init.xavier_normal_ for Linear (out,in) / Conv (out,in,kh,kw)."""
    if len(shape) == 2:
        fan_out, fan_in = shape
    else:
        rf = shape[2] * shape[3]
        fan_out, fan_in = shape[0] * rf, shape[1] * rf
    std = math.sqrt(2.0 / (fan_in + fan_out))
    return std * jax.random.normal(key, shape, dtype=jnp.float32)


def init_raw_params(key):
    """Raw PyTorch-layout parameters (biases of Linear layers are 0.01)."""
    ks = jax.random.split(key, 5)
    return {
        "text_w": _xavier_normal(ks[0], (256, TEXT_SIZE)),
        "seed_w": _xavier_normal(ks[1], (512, SEED_SIZE)),
        "lin_w":  _xavier_normal(ks[2], (512, 768)),
        "conv_w": _xavier_normal(ks[3], (128, 128, 3, 3)),   # bias=False
        "img_w":  _xavier_normal(ks[4], (3, 128, 1, 1)),     # bias=False
    }


def prepare_weights(raw):
    """Fold clamp / BN / reshape / conv geometry / upsample / x2 into bf16 slabs."""
    assert LAYERS == 1, "weight folding is specialised to layers == 1"
    s = BN_SCALE

    # text_in / seed_in: Linear + eval-BN, packed block-diagonally.
    wt = raw["text_w"].T * s                               # (32, 256)
    ws = raw["seed_w"].T * s                               # (256, 512)
    w_in = jnp.zeros((TEXT_SIZE + SEED_SIZE, 256 + 512), jnp.float32)
    w_in = w_in.at[:TEXT_SIZE, :256].set(wt)
    w_in = w_in.at[TEXT_SIZE:, 256:].set(ws)
    b_in = jnp.full((1, 768), 0.01 * s, jnp.float32)

    # lin: Linear(768->512)+BN.  Permute columns from PyTorch feature order
    # (c*4 + h*2 + w) to position-major (p*128 + c), p = h*2 + w.
    wl = raw["lin_w"].T * s                                # (768, 512)
    cols = jnp.arange(512)
    perm = (cols % 128) * 4 + cols // 128                  # old col per new col
    w_mid = wl[:, perm]
    b_mid = jnp.full((1, 512), 0.01 * s, jnp.float32)      # constant -> perm no-op

    # cnn_list[0]: clamp + BN fold, then collapse the 3x3 reflect-pad conv on
    # the 2x2 map into a (512, 512) block matrix.  With reflect padding of a
    # size-2 axis, tap k==1 reads index i and k in {0,2} read index 1-i, so
    # each output pixel has only 4 effective 128x128 taps.
    wc = jnp.clip(raw["conv_w"], -1.0, 1.0) * s            # (cout, cin, 3, 3)
    A  = wc[:, :, 1, 1].T                                                   # centre
    Bw = (wc[:, :, 1, 0] + wc[:, :, 1, 2]).T                                # row i, col 1-j
    Bh = (wc[:, :, 0, 1] + wc[:, :, 2, 1]).T                                # row 1-i, col j
    Cc = (wc[:, :, 0, 0] + wc[:, :, 0, 2] + wc[:, :, 2, 0] + wc[:, :, 2, 2]).T  # corners
    blocks = [[None] * 4 for _ in range(4)]                # blocks[in_pos][out_pos]
    for q in range(4):
        i, j = divmod(q, 2)
        blocks[i * 2 + j][q] = A
        blocks[i * 2 + (1 - j)][q] = Bw
        blocks[(1 - i) * 2 + j][q] = Bh
        blocks[(1 - i) * 2 + (1 - j)][q] = Cc
    wconv = jnp.block(blocks)                              # (512, 512)

    # image_out 1x1 conv (clamp) + BN2d + bilinear x2 upsample (align_corners):
    # the pointwise conv commutes with the interpolation -> one (512, 48)
    # matrix; columns are NHWC-flat (I*4 + J)*3 + c.  The extra factor 2 turns
    # (tanh(z)+1)/2 into the sigmoid applied in-kernel.  Pad to 128 lanes so
    # the kernel's output store is lane-dense.
    wi = jnp.clip(raw["img_w"][:, :, 0, 0], -1.0, 1.0).T * (2.0 * s)  # (128, 3)
    U = jnp.array([[1.0, 0.0], [2.0 / 3, 1.0 / 3], [1.0 / 3, 2.0 / 3], [0.0, 1.0]],
                  jnp.float32)                             # (out 4, in 2)
    K = jnp.einsum("ip,jq->pqij", U, U)                    # K[ph,pw,I,J] = U[I,ph]*U[J,pw]
    wfin = jnp.einsum("pqij,nc->pqnijc", K, wi).reshape(512, 48)
    wfin = jnp.pad(wfin, ((0, 0), (0, 128 - 48)))
    w_out = jnp.concatenate([wconv, wfin], axis=1)         # (512, 640)

    bias = jnp.concatenate([b_in, b_mid], axis=1)          # (1, 1280), stays f32

    return {
        "w_in":  w_in.astype(jnp.bfloat16),
        "w_mid": w_mid.astype(jnp.bfloat16),
        "w_out": w_out.astype(jnp.bfloat16),
        "bias":  bias,
    }


# ----------------------- pure-JAX reference (eval mode) ---------------------

def _reference_forward(raw, text, seed):
    hp = jax.lax.Precision.HIGHEST
    leaky = lambda v: jnp.where(v >= 0.0, v, NEG_SLOPE * v)
    s = BN_SCALE
    B = text.shape[0]
    t = leaky((jnp.dot(text, raw["text_w"].T, precision=hp) + 0.01) * s)
    sd = leaky((jnp.dot(seed, raw["seed_w"].T, precision=hp) + 0.01) * s)
    x = leaky(jnp.concatenate([t, sd], axis=-1))
    x = leaky((jnp.dot(x, raw["lin_w"].T, precision=hp) + 0.01) * s)
    x = x.reshape(B, 128, 2, 2)
    xp = jnp.pad(x, ((0, 0), (0, 0), (1, 1), (1, 1)), mode="reflect")
    wc = jnp.clip(raw["conv_w"], -1.0, 1.0)
    y = jax.lax.conv_general_dilated(
        xp, wc, window_strides=(1, 1), padding="VALID",
        dimension_numbers=("NCHW", "OIHW", "NCHW"), precision=hp)
    y = leaky(y * s)
    U = jnp.array([[1.0, 0.0], [2.0 / 3, 1.0 / 3], [1.0 / 3, 2.0 / 3], [0.0, 1.0]],
                  jnp.float32)
    y = jnp.einsum("ih,jw,bchw->bcij", U, U, y, precision=hp)   # bilinear x2, align_corners
    wi = jnp.clip(raw["img_w"][:, :, 0, 0], -1.0, 1.0)
    z = jnp.einsum("oc,bcij->boij", wi, y, precision=hp) * s
    img = (jnp.tanh(z) + 1.0) * 0.5
    return jnp.transpose(img, (0, 2, 3, 1))                     # NHWC


# ---------------------------------- main -------------------------------------

if __name__ == "__main__":
    key = jax.random.PRNGKey(0)
    k_params, k_text, k_seed = jax.random.split(key, 3)

    B = 2
    raw = init_raw_params(k_params)
    weights = prepare_weights(raw)

    text = jax.random.normal(k_text, (B, TEXT_SIZE), dtype=jnp.float32)
    seed = jax.random.normal(k_seed, (B, SEED_SIZE), dtype=jnp.float32)
    trans_level = jnp.float32(0.5)                 # unused (transitioning=False)

    fwd = jax.jit(generator_forward)
    out = jax.block_until_ready(fwd(weights, text, seed, trans_level))

    side = 2 ** (LAYERS + 1)
    assert out.shape == (B, side, side, 3)
    assert bool(jnp.all(jnp.isfinite(out)))

    ref = _reference_forward(raw, text, seed)
    err = float(jnp.max(jnp.abs(out - ref)))
    assert err < 1e-2, f"mismatch vs reference: {err}"
    print("KERNEL_OK")
</pallas_src>

<mosaic_0001>
module attributes {stable_mosaic.version = 11 : i64} {
  func.func @_generator_kernel(%arg0: i32, %arg1: memref<8x288xf32, #tpu.memory_space<vmem>>, %arg2: memref<288x768xbf16, #tpu.memory_space<vmem>>, %arg3: memref<768x512xbf16, #tpu.memory_space<vmem>>, %arg4: memref<512x640xbf16, #tpu.memory_space<vmem>>, %arg5: memref<1x1280xf32, #tpu.memory_space<vmem>>, %arg6: memref<8x128xf32, #tpu.memory_space<vmem>>) attributes {dimension_semantics = [#tpu.dimension_semantics<parallel>], iteration_bounds = array<i64: 1>, scalar_prefetch = 0 : i64, scratch_operands = 0 : i64, tpu.core_type = #tpu.core_type<tc>, window_params = [{transform_indices = @transform_0, window_bounds = array<i64: 8, 288>}, {pipeline_mode = #tpu.pipeline_mode<synchronous>, transform_indices = @transform_1, window_bounds = array<i64: 288, 768>}, {pipeline_mode = #tpu.pipeline_mode<synchronous>, transform_indices = @transform_2, window_bounds = array<i64: 768, 512>}, {pipeline_mode = #tpu.pipeline_mode<synchronous>, transform_indices = @transform_3, window_bounds = array<i64: 512, 640>}, {pipeline_mode = #tpu.pipeline_mode<synchronous>, transform_indices = @transform_4, window_bounds = array<i64: 1, 1280>}, {transform_indices = @transform_5, window_bounds = array<i64: 8, 128>}]} {
    %c0 = arith.constant 0 : index
    %c0_0 = arith.constant 0 : index
    %0 = vector.load %arg1[%c0, %c0_0] : memref<8x288xf32, #tpu.memory_space<vmem>>, vector<8x288xf32>
    %1 = arith.truncf %0 : vector<8x288xf32> to vector<8x288xbf16>
    %c0_1 = arith.constant 0 : index
    %c0_2 = arith.constant 0 : index
    %2 = vector.load %arg2[%c0_1, %c0_2] : memref<288x768xbf16, #tpu.memory_space<vmem>>, vector<288x768xbf16>
    %cst = arith.constant dense<0.000000e+00> : vector<8x768xf32>
    %3 = tpu.matmul %1, %2, %cst {dimension_numbers = #tpu.dot_dimension_numbers<[1], [0], [0], [1], [0, 0, 1, 1], [], []>} : vector<8x288xbf16>, vector<288x768xbf16>, vector<8x768xf32> -> vector<8x768xf32>
    %c0_3 = arith.constant 0 : index
    %c0_4 = arith.constant 0 : index
    %4 = vector.load %arg5[%c0_3, %c0_4] : memref<1x1280xf32, #tpu.memory_space<vmem>>, vector<1x768xf32>
    %5 = vector.broadcast %4 : vector<1x768xf32> to vector<8x768xf32>
    %6 = arith.addf %3, %5 : vector<8x768xf32>
    %cst_5 = arith.constant 0.000000e+00 : f32
    %7 = vector.broadcast %cst_5 : f32 to vector<8x768xf32>
    %8 = arith.cmpf oge, %6, %7 : vector<8x768xf32>
    %cst_6 = arith.constant 9.99999974E-5 : f32
    %9 = vector.broadcast %cst_6 : f32 to vector<8x768xf32>
    %10 = arith.mulf %9, %6 : vector<8x768xf32>
    %11 = arith.select %8, %6, %10 : vector<8x768xi1>, vector<8x768xf32>
    %12 = arith.truncf %11 : vector<8x768xf32> to vector<8x768xbf16>
    %c0_7 = arith.constant 0 : index
    %c0_8 = arith.constant 0 : index
    %13 = vector.load %arg3[%c0_7, %c0_8] : memref<768x512xbf16, #tpu.memory_space<vmem>>, vector<768x512xbf16>
    %cst_9 = arith.constant dense<0.000000e+00> : vector<8x512xf32>
    %14 = tpu.matmul %12, %13, %cst_9 {dimension_numbers = #tpu.dot_dimension_numbers<[1], [0], [0], [1], [0, 0, 1, 1], [], []>} : vector<8x768xbf16>, vector<768x512xbf16>, vector<8x512xf32> -> vector<8x512xf32>
    %c0_10 = arith.constant 0 : index
    %c768 = arith.constant 768 : index
    %15 = vector.load %arg5[%c0_10, %c768] : memref<1x1280xf32, #tpu.memory_space<vmem>>, vector<1x512xf32>
    %16 = vector.broadcast %15 : vector<1x512xf32> to vector<8x512xf32>
    %17 = arith.addf %14, %16 : vector<8x512xf32>
    %cst_11 = arith.constant 0.000000e+00 : f32
    %18 = vector.broadcast %cst_11 : f32 to vector<8x512xf32>
    %19 = arith.cmpf oge, %17, %18 : vector<8x512xf32>
    %cst_12 = arith.constant 0.00999999977 : f32
    %20 = vector.broadcast %cst_12 : f32 to vector<8x512xf32>
    %21 = arith.mulf %20, %17 : vector<8x512xf32>
    %22 = arith.select %19, %17, %21 : vector<8x512xi1>, vector<8x512xf32>
    %23 = arith.truncf %22 : vector<8x512xf32> to vector<8x512xbf16>
    %c0_13 = arith.constant 0 : index
    %c0_14 = arith.constant 0 : index
    %24 = vector.load %arg4[%c0_13, %c0_14] : memref<512x640xbf16, #tpu.memory_space<vmem>>, vector<512x512xbf16>
    %cst_15 = arith.constant dense<0.000000e+00> : vector<8x512xf32>
    %25 = tpu.matmul %23, %24, %cst_15 {dimension_numbers = #tpu.dot_dimension_numbers<[1], [0], [0], [1], [0, 0, 1, 1], [], []>} : vector<8x512xbf16>, vector<512x512xbf16>, vector<8x512xf32> -> vector<8x512xf32>
    %cst_16 = arith.constant 0.000000e+00 : f32
    %26 = vector.broadcast %cst_16 : f32 to vector<8x512xf32>
    %27 = arith.cmpf oge, %25, %26 : vector<8x512xf32>
    %cst_17 = arith.constant 0.00999999977 : f32
    %28 = vector.broadcast %cst_17 : f32 to vector<8x512xf32>
    %29 = arith.mulf %28, %25 : vector<8x512xf32>
    %30 = arith.select %27, %25, %29 : vector<8x512xi1>, vector<8x512xf32>
    %31 = arith.truncf %30 : vector<8x512xf32> to vector<8x512xbf16>
    %c0_18 = arith.constant 0 : index
    %c512 = arith.constant 512 : index
    %32 = vector.load %arg4[%c0_18, %c512] : memref<512x640xbf16, #tpu.memory_space<vmem>>, vector<512x128xbf16>
    %cst_19 = arith.constant dense<0.000000e+00> : vector<8x128xf32>
    %33 = tpu.matmul %31, %32, %cst_19 {dimension_numbers = #tpu.dot_dimension_numbers<[1], [0], [0], [1], [0, 0, 1, 1], [], []>} : vector<8x512xbf16>, vector<512x128xbf16>, vector<8x128xf32> -> vector<8x128xf32>
    %cst_20 = arith.constant 0.000000e+00 : f32
    %34 = vector.broadcast %cst_20 : f32 to vector<8x128xf32>
    %35 = arith.subf %34, %33 : vector<8x128xf32>
    %36 = math.exp %35 : vector<8x128xf32>
    %cst_21 = arith.constant 1.000000e+00 : f32
    %37 = vector.broadcast %cst_21 : f32 to vector<8x128xf32>
    %38 = arith.addf %37, %36 : vector<8x128xf32>
    %cst_22 = arith.constant 1.000000e+00 : f32
    %39 = vector.broadcast %cst_22 : f32 to vector<8x128xf32>
    %40 = arith.divf %39, %38 : vector<8x128xf32>
    %c0_23 = arith.constant 0 : index
    %c0_24 = arith.constant 0 : index
    %41 = vector.load %arg6[%c0_23, %c0_24] : memref<8x128xf32, #tpu.memory_space<vmem>>, vector<8x128xf32>
    tpu.vector_store %arg6[%c0_23, %c0_24], %40 {strides = array<i32>} : memref<8x128xf32, #tpu.memory_space<vmem>>, vector<8x128xf32>,
    return
  }
  func.func @transform_0(%arg0: i32) -> (i32, i32) {
    %c0_i32 = arith.constant 0 : i32
    %c0_i32_0 = arith.constant 0 : i32
    return %arg0, %c0_i32 : i32, i32
  }
  func.func @transform_1(%arg0: i32) -> (i32, i32) {
    %c0_i32 = arith.constant 0 : i32
    %c0_i32_0 = arith.constant 0 : i32
    %c0_i32_1 = arith.constant 0 : i32
    return %c0_i32, %c0_i32_0 : i32, i32
  }
  func.func @transform_2(%arg0: i32) -> (i32, i32) {
    %c0_i32 = arith.constant 0 : i32
    %c0_i32_0 = arith.constant 0 : i32
    %c0_i32_1 = arith.constant 0 : i32
    return %c0_i32, %c0_i32_0 : i32, i32
  }
  func.func @transform_3(%arg0: i32) -> (i32, i32) {
    %c0_i32 = arith.constant 0 : i32
    %c0_i32_0 = arith.constant 0 : i32
    %c0_i32_1 = arith.constant 0 : i32
    return %c0_i32, %c0_i32_0 : i32, i32
  }
  func.func @transform_4(%arg0: i32) -> (i32, i32) {
    %c0_i32 = arith.constant 0 : i32
    %c0_i32_0 = arith.constant 0 : i32
    %c0_i32_1 = arith.constant 0 : i32
    return %c0_i32, %c0_i32_0 : i32, i32
  }
  func.func @transform_5(%arg0: i32) -> (i32, i32) {
    %c0_i32 = arith.constant 0 : i32
    %c0_i32_0 = arith.constant 0 : i32
    return %arg0, %c0_i32 : i32, i32
  }
}

</mosaic_0001>

<bundles_post_ra>
// kernel: generator_forward.1
= control target key start
LH: loop header
LB: loop body
LE: loop exit
PB: predicated region body
PF: predicated region fallthrough
CT: control target
= control target key end

     0   :  { %10 = vsyncpa [#allocation3], 0  ;;  %s5228_s0 = inlined_call_operand.vmem [shape: f32[8,288], index: 0, kind: input, shape index: {}]   ;;  %s5229_s1 = inlined_call_operand.hbm [shape: bf16[288,768], index: 1, kind: input, shape index: {}]   ;;  %s5230_s2 = inlined_call_operand.hbm [shape: bf16[768,512], index: 2, kind: input, shape index: {}]   ;;  %s5231_s3 = inlined_call_operand.hbm [shape: bf16[512,640], index: 3, kind: input, shape index: {}]   ;;  %s5232_s4 = inlined_call_operand.vmem [shape: f32[1,1280], index: 4, kind: input, shape index: {}]   ;;  %s5233_s5 = inlined_call_operand.vmem [shape: f32[8,128], index: 5, kind: output, shape index: {}]  }
   0x1   :  { %11 = vsyncpa [#allocation5], 0  ;;  %s5066_s18 = smov [#allocation4]   ;;  %s4996_s22 = scalar_lea.hbm %s5230_s2, 24576 }
   0x2   :  { %s31_s19 = sshll.u32 %s5066_s18, 4  ;;  %p4997_p0 = scmp.ne.s32.totalorder %s5230_s2, %s4996_s22  ;;  %s32_s19 = int_to_ptr.vmem [resolvable:$true] %s31_s19 }
   0x3   :  { %p5000_p1 = scmp.lt.u32.totalorder %s4996_s22, %s5230_s2 }
   0x5   :  { %p5002_p2 = pnand %p5000_p1, %p4997_p0 }
   0x7   :  { %5005 = shalt.err (!%p5002_p2)
}
   0x8   :  { %s5006_s27 = scalar_lea.vmem %s32_s19, 24576  ;;  %p5011_p4 = scmp.lt.s32.totalorder %s32_s19, %s32_s19 }
   0x9   :  { %p5007_p3 = scmp.ne.s32.totalorder %s32_s19, %s5006_s27  ;;  %p5012_p5 = scmp.lt.s32.totalorder %s5006_s27, %s5006_s27 }
   0xb   :  { %p5013_p6 = por %p5012_p5, %p5011_p4 }
   0xd   :  { %p5014_p7 = pnand %p5013_p6, %p5007_p3 }
   0xf   :  { %5017 = shalt.err (!%p5014_p7)
}
  0x10   :  { %s5067_s28 = smov 256   ;;  %s5068_s29 = smov 16  }
  0x11   :  { %37 = dma.hbm_to_vmem [thread:$0]  %s5230_s2, 24576, %s32_s19, [#allocation5], %s5067_s28, %s5067_s28, %s5068_s29  }
  0x12   :  { %s5069_s7 = smov [#allocation2]   ;;  %s5018_s11 = scalar_lea.hbm %s5229_s1, 13824 }
  0x13   :  { %s19_s8 = sshll.u32 %s5069_s7, 4  ;;  %p5019_p8 = scmp.ne.s32.totalorder %s5229_s1, %s5018_s11  ;;  %s20_s8 = int_to_ptr.vmem [resolvable:$true] %s19_s8 }
  0x14   :  { %p5022_p9 = scmp.lt.u32.totalorder %s5018_s11, %s5229_s1 }
  0x16   :  { %p5024_p10 = pnand %p5022_p9, %p5019_p8 }
  0x18   :  { %5027 = shalt.err (!%p5024_p10)
}
  0x19   :  { %s5028_s16 = scalar_lea.vmem %s20_s8, 13824  ;;  %p5033_p12 = scmp.lt.s32.totalorder %s20_s8, %s20_s8 }
  0x1a   :  { %p5029_p11 = scmp.ne.s32.totalorder %s20_s8, %s5028_s16  ;;  %p5034_p13 = scmp.lt.s32.totalorder %s5028_s16, %s5028_s16 }
  0x1c   :  { %p5035_p0 = por %p5034_p13, %p5033_p12 }
  0x1e   :  { %p5036_p1 = pnand %p5035_p0, %p5029_p11 }
  0x20   :  { %5039 = shalt.err (!%p5036_p1)
}
  0x21   :  { %s5070_s2 = smov 384   ;;  %s5071_s17 = smov 24  }
  0x22   :  { %25 = dma.hbm_to_vmem [thread:$0]  %s5229_s1, 13824, %s20_s8, [#allocation3], %s5070_s2, %s5070_s2, %s5071_s17  }
  0x23   :  { %s5072_s20 = smov [#allocation6]   ;;  %s5040_s24 = scalar_lea.hbm %s5231_s3, 20480 }
  0x24   :  { %s43_s21 = sshll.u32 %s5072_s20, 4  ;;  %p5041_p2 = scmp.ne.s32.totalorder %s5231_s3, %s5040_s24  ;;  %s44_s21 = int_to_ptr.vmem [resolvable:$true] %s43_s21 }
  0x25   :  { %p5044_p3 = scmp.lt.u32.totalorder %s5040_s24, %s5231_s3 }
  0x27   :  { %p5046_p4 = pnand %p5044_p3, %p5041_p2 }
  0x29   :  { %5049 = shalt.err (!%p5046_p4)
}
  0x2a   :  { %s5050_s29 = scalar_lea.vmem %s44_s21, 20480  ;;  %p5055_p6 = scmp.lt.s32.totalorder %s44_s21, %s44_s21 }
  0x2b   :  { %p5051_p5 = scmp.ne.s32.totalorder %s44_s21, %s5050_s29  ;;  %p5056_p7 = scmp.lt.s32.totalorder %s5050_s29, %s5050_s29 }
  0x2d   :  { %p5057_p8 = por %p5056_p7, %p5055_p6 }
  0x2f   :  { %p5058_p9 = pnand %p5057_p8, %p5051_p5 }
  0x31   :  { %5061 = shalt.err (!%p5058_p9)
}
  0x32   :  { %s5073_s1 = smov 320   ;;  %s5074_s30 = smov 20  }
  0x33   :  { %49 = dma.hbm_to_vmem [thread:$0]  %s5231_s3, 20480, %s44_s21, [#allocation5], %s5073_s1, %s5073_s1, %s5074_s30  }
  0x34   :  { %5062 = dma.done.wait [#allocation3], 13824  }
  0x35   :  { %5063 = vsyncadd [#allocation3], 4294953472 }
  0x36   :  { %5064 = dma.done.wait [#allocation5], 45056  }
  0x37   :  { %5065 = vsyncadd [#allocation5], 4294922240  ;;  %v4318_v0 = vld [vmem:[#allocation2 + $0x4] ss:$24 sps:$4 sm:$0xff]   ;;  %v4320_v1 = vld [vmem:[#allocation2] ss:$24 sps:$4 sm:$0xff]  }
  0x38   :  { %752 = vmatprep.subr.bf16.mxu0 %v4318_v0  ;;  %v4321_v2 = vld [vmem:[#allocation2 + $0x34] ss:$24 sps:$4 sm:$0xff]   ;;  %v4323_v3 = vld [vmem:[#allocation2 + $0x30] ss:$24 sps:$4 sm:$0xff]   ;;  %v4324_v4 = vld [vmem:[#allocation2 + $0x64] ss:$24 sps:$4 sm:$0xff]  }
  0x39   :  { %753 = vmatpush1.bf16.msra.mxu0 %v4320_v1  ;;  %v4326_v5 = vld [vmem:[#allocation2 + $0x60] ss:$24 sps:$4 sm:$0xff]   ;;  %v4327_v6 = vld [vmem:[#allocation2 + $0x94] ss:$24 sps:$4 sm:$0xff]   ;;  %v4329_v7 = vld [vmem:[#allocation2 + $0x90] ss:$24 sps:$4 sm:$0xff]  }
  0x3a   :  { %754 = vmatprep.subr.bf16.mxu0 %v4321_v2  ;;  %v4330_v8 = vld [vmem:[#allocation2 + $0xc4] ss:$24 sps:$4 sm:$0xff]   ;;  %v4332_v9 = vld [vmem:[#allocation2 + $0xc0] ss:$24 sps:$4 sm:$0xff]   ;;  %v4333_v10 = vld [vmem:[#allocation2 + $0xf4] ss:$24 sps:$4 sm:$0xff]  }
  0x3b   :  { %v4357_v11 = vld [vmem:[#allocation2 + $0xc] ss:$24 sps:$4 sm:$0xff]   ;;  %v4359_v12 = vld [vmem:[#allocation2 + $0x8] ss:$24 sps:$4 sm:$0xff]   ;;  %v4363_v15 = vld [vmem:[#allocation2 + $0x3c] ss:$24 sps:$4 sm:$0xff]  }
  0x3c   :  { %v4335_v13 = vld [vmem:[#allocation2 + $0xf0] ss:$24 sps:$4 sm:$0xff]   ;;  %v4336_v14 = vld [vmem:[#allocation2 + $0x124] ss:$24 sps:$4 sm:$0xff]   ;;  %834 = vmatprep.subr.bf16.mxu1 %v4357_v11  ;;  %v4338_v17 = vld [vmem:[#allocation2 + $0x120] ss:$24 sps:$4 sm:$0xff]  }
  0x3d   :  { %755 = vmatpush1.bf16.msra.mxu0 %v4323_v3  ;;  %835 = vmatpush1.bf16.msra.mxu1 %v4359_v12  ;;  %v4365_v16 = vld [vmem:[#allocation2 + $0x38] ss:$24 sps:$4 sm:$0xff]   ;;  %v4369_v18 = vld [vmem:[#allocation2 + $0x6c] ss:$24 sps:$4 sm:$0xff]   ;;  %v4371_v20 = vld [vmem:[#allocation2 + $0x68] ss:$24 sps:$4 sm:$0xff]  }
  0x3e   :  { %756 = vmatprep.subr.bf16.mxu0 %v4324_v4  ;;  %836 = vmatprep.subr.bf16.mxu1 %v4363_v15  ;;  %v4339_v19 = vld [vmem:[#allocation2 + $0x154] ss:$24 sps:$4 sm:$0xff]   ;;  %v4341_v23 = vld [vmem:[#allocation2 + $0x150] ss:$24 sps:$4 sm:$0xff]   ;;  %v4342_v25 = vld [vmem:[#allocation2 + $0x184] ss:$24 sps:$4 sm:$0xff]  }
  0x3f   :  { %v4375_v21 = vld [vmem:[#allocation2 + $0x9c] ss:$24 sps:$4 sm:$0xff]   ;;  %v63_v22 = vld [vmem:[%s5228_s0 + $0x8] sm:$0xff]  ;;  %v4377_v26 = vld [vmem:[#allocation2 + $0x98] ss:$24 sps:$4 sm:$0xff]   ;;  %v5075_v3 = vmov 0  }
  0x40   :  { %v5145_v24 = vpack.c.bf16 %v63_v22, %v63_v22  ;;  %v4381_v27 = vld [vmem:[#allocation2 + $0xcc] ss:$24 sps:$4 sm:$0xff]   ;;  %v4344_v28 = vld [vmem:[#allocation2 + $0x180] ss:$24 sps:$4 sm:$0xff]   ;;  %v4387_v31 = vld [vmem:[#allocation2 + $0xfc] ss:$24 sps:$4 sm:$0xff]  }
  0x41   :  { %757 = vmatpush1.bf16.msra.mxu0 %v4326_v5  ;;  %837 = vmatpush1.bf16.msra.mxu1 %v4365_v16  ;;  %v4345_v29 = vld [vmem:[#allocation2 + $0x1b4] ss:$24 sps:$4 sm:$0xff]   ;;  %v4383_v30 = vld [vmem:[#allocation2 + $0xc8] ss:$24 sps:$4 sm:$0xff]   ;;  %v4348_v33 = vld [vmem:[#allocation2 + $0x1e4] ss:$24 sps:$4 sm:$0xff]  }
  0x42   :  { %758 = vmatprep.subr.bf16.mxu0 %v4327_v6  ;;  %838 = vmatprep.subr.bf16.mxu1 %v4369_v18  ;;  %v4347_v32 = vld [vmem:[#allocation2 + $0x1b0] ss:$24 sps:$4 sm:$0xff]   ;;  %v4390_v35 = vld [vmem:[#allocation2 + $0x12c] ss:$24 sps:$4 sm:$0xff]   ;;  %v4350_v36 = vld [vmem:[#allocation2 + $0x1e0] ss:$24 sps:$4 sm:$0xff]  }
  0x43   :  { %784 = vmatprep.mubr.bf16.mxu0 %v5145_v24  ;;  %866 = vmatprep.mubr.bf16.mxu1 %v5145_v24  ;;  %v4389_v34 = vld [vmem:[#allocation2 + $0xf8] ss:$24 sps:$4 sm:$0xff]   ;;  %v4351_v37 = vld [vmem:[#allocation2 + $0x214] ss:$24 sps:$4 sm:$0xff]   ;;  %v4392_v38 = vld [vmem:[#allocation2 + $0x128] ss:$24 sps:$4 sm:$0xff]  }
  0x44   :  { %v4393_v39 = vld [vmem:[#allocation2 + $0x15c] ss:$24 sps:$4 sm:$0xff]   ;;  %v4353_v40 = vld [vmem:[#allocation2 + $0x210] ss:$24 sps:$4 sm:$0xff]   ;;  %v4396_v43 = vld [vmem:[#allocation2 + $0x18c] ss:$24 sps:$4 sm:$0xff]  }
  0x45   :  { %759 = vmatpush1.bf16.msra.mxu0 %v4329_v7  ;;  %839 = vmatpush1.bf16.msra.mxu1 %v4371_v20  ;;  %v4354_v41 = vld [vmem:[#allocation2 + $0x244] ss:$24 sps:$4 sm:$0xff]   ;;  %v4395_v42 = vld [vmem:[#allocation2 + $0x158] ss:$24 sps:$4 sm:$0xff]   ;;  %v4360_v45 = vld [vmem:[#allocation2 + $0x274] ss:$24 sps:$4 sm:$0xff]  }
  0x46   :  { %760 = vmatprep.subr.bf16.mxu0 %v4330_v8  ;;  %840 = vmatprep.subr.bf16.mxu1 %v4375_v21  ;;  %v4356_v44 = vld [vmem:[#allocation2 + $0x240] ss:$24 sps:$4 sm:$0xff]   ;;  %v4399_v47 = vld [vmem:[#allocation2 + $0x1bc] ss:$24 sps:$4 sm:$0xff]   ;;  %v4362_v48 = vld [vmem:[#allocation2 + $0x270] ss:$24 sps:$4 sm:$0xff]  }
  0x47   :  { %v4398_v46 = vld [vmem:[#allocation2 + $0x188] ss:$24 sps:$4 sm:$0xff]   ;;  %v4366_v49 = vld [vmem:[#allocation2 + $0x2a4] ss:$24 sps:$4 sm:$0xff]   ;;  %v4401_v50 = vld [vmem:[#allocation2 + $0x1b8] ss:$24 sps:$4 sm:$0xff]  }
  0x48   :  { %v4402_v51 = vld [vmem:[#allocation2 + $0x1ec] ss:$24 sps:$4 sm:$0xff]   ;;  %v4368_v52 = vld [vmem:[#allocation2 + $0x2a0] ss:$24 sps:$4 sm:$0xff]   ;;  %v4405_v55 = vld [vmem:[#allocation2 + $0x21c] ss:$24 sps:$4 sm:$0xff]  }
  0x49   :  { %761 = vmatpush1.bf16.msra.mxu0 %v4332_v9  ;;  %841 = vmatpush1.bf16.msra.mxu1 %v4377_v26  ;;  %v4372_v53 = vld [vmem:[#allocation2 + $0x2d4] ss:$24 sps:$4 sm:$0xff]   ;;  %v4404_v54 = vld [vmem:[#allocation2 + $0x1e8] ss:$24 sps:$4 sm:$0xff]   ;;  %v4380_v58 = vld [vmem:[#allocation2 + $0x304] ss:$24 sps:$4 sm:$0xff]  }
  0x4a   :  { %762 = vmatprep.subr.bf16.mxu0 %v4333_v10  ;;  %842 = vmatprep.subr.bf16.mxu1 %v4381_v27  ;;  %v4374_v56 = vld [vmem:[#allocation2 + $0x2d0] ss:$24 sps:$4 sm:$0xff]   ;;  %v62_v57 = vld [vmem:[%s5228_s0] sm:$0xff]  ;;  %v4386_v63 = vld [vmem:[#allocation2 + $0x334] ss:$24 sps:$4 sm:$0xff]   ;;  %vm748_vm0 = vcmask 261120  }
  0x4b   :  { %v4407_v59 = vld [vmem:[#allocation2 + $0x218] ss:$24 sps:$4 sm:$0xff]   ;;  %v5152_v60 = vpack.c.bf16 %v62_v57, %v62_v57  ;;  %v4408_v61 = vld [vmem:[#allocation2 + $0x24c] ss:$24 sps:$4 sm:$0xff]   ;;  %v4410_v0 = vld [vmem:[#allocation2 + $0x248] ss:$24 sps:$4 sm:$0xff]  }
  0x4c   :  { %v4378_v62 = vld [vmem:[#allocation2 + $0x300] ss:$24 sps:$4 sm:$0xff]   ;;  %v4411_v1 = vld [vmem:[#allocation2 + $0x27c] ss:$24 sps:$4 sm:$0xff]   ;;  %v4384_v2 = vld [vmem:[#allocation2 + $0x330] ss:$24 sps:$4 sm:$0xff]  }
  0x4d   :  { %763 = vmatpush1.bf16.msra.mxu0 %v4335_v13  ;;  %843 = vmatpush1.bf16.msra.mxu1 %v4383_v30  ;;  %v4422_v4 = vld [vmem:[#allocation2 + $0x14] ss:$24 sps:$4 sm:$0xff]   ;;  %v4413_v5 = vld [vmem:[#allocation2 + $0x278] ss:$24 sps:$4 sm:$0xff]   ;;  %v4416_v8 = vld [vmem:[#allocation2 + $0x2a8] ss:$24 sps:$4 sm:$0xff]  }
  0x4e   :  { %764 = vmatprep.subr.bf16.mxu0 %v4336_v14  ;;  %844 = vmatprep.subr.bf16.mxu1 %v4387_v31  ;;  %v4414_v6 = vld [vmem:[#allocation2 + $0x2ac] ss:$24 sps:$4 sm:$0xff]   ;;  %v64_v7 = vld [vmem:[%s5228_s0 + $0x10] sm:$0xff]  ;;  %v4423_v15 = vld [vmem:[#allocation2 + $0x40] ss:$24 sps:$4 sm:$0xff]  }
  0x4f   :  { %v5159_v9 = vpack.c.bf16 %v64_v7, %v64_v7  ;;  %v4417_v10 = vld [vmem:[#allocation2 + $0x2dc] ss:$24 sps:$4 sm:$0xff]   ;;  %v4420_v11 = vld [vmem:[#allocation2 + $0x10] ss:$24 sps:$4 sm:$0xff]   ;;  %v4428_v14 = vld [vmem:[#allocation2 + $0x30c] ss:$24 sps:$4 sm:$0xff]  }
  0x50   :  { %v4425_v12 = vld [vmem:[#allocation2 + $0x44] ss:$24 sps:$4 sm:$0xff]   ;;  %v4419_v13 = vld [vmem:[#allocation2 + $0x2d8] ss:$24 sps:$4 sm:$0xff]   ;;  %v4431_v16 = vld [vmem:[#allocation2 + $0x74] ss:$24 sps:$4 sm:$0xff]  }
  0x51   :  { %765 = vmatpush1.bf16.msra.mxu0 %v4338_v17  ;;  %845 = vmatpush1.bf16.msra.mxu1 %v4389_v34  ;;  %v4426_v17 = vld [vmem:[#allocation2 + $0x308] ss:$24 sps:$4 sm:$0xff]   ;;  %v4434_v18 = vld [vmem:[#allocation2 + $0x33c] ss:$24 sps:$4 sm:$0xff]   ;;  %v4432_v21 = vld [vmem:[#allocation2 + $0x338] ss:$24 sps:$4 sm:$0xff]  }
  0x52   :  { %766 = vmatprep.subr.bf16.mxu0 %v4339_v19  ;;  %846 = vmatprep.subr.bf16.mxu1 %v4390_v35  ;;  %v4429_v19 = vld [vmem:[#allocation2 + $0x70] ss:$24 sps:$4 sm:$0xff]   ;;  %v4437_v20 = vld [vmem:[#allocation2 + $0xa4] ss:$24 sps:$4 sm:$0xff]   ;;  %v4446_v30 = vld [vmem:[#allocation2 + $0x134] ss:$24 sps:$4 sm:$0xff]  }
  0x53   :  { %v4482_v22 = vld [vmem:[#allocation4 + $0x4] ss:$16 sps:$4 sm:$0xff]   ;;  %v4480_v27 = vld [vmem:[#allocation4] ss:$16 sps:$4 sm:$0xff]  }
  0x54   :  { %v4443_v26 = vld [vmem:[#allocation2 + $0x104] ss:$24 sps:$4 sm:$0xff]   ;;  %v4486_v31 = vld [vmem:[#allocation4 + $0x20] ss:$16 sps:$4 sm:$0xff]  }
  0x55   :  { %767 = vmatpush1.bf16.msra.mxu0 %v4341_v23  ;;  %847 = vmatpush1.bf16.msra.mxu1 %v4392_v38  ;;  %v4435_v23 = vld [vmem:[#allocation2 + $0xa0] ss:$24 sps:$4 sm:$0xff]   ;;  %v4449_v34 = vld [vmem:[#allocation2 + $0x164] ss:$24 sps:$4 sm:$0xff]   ;;  %v4452_v38 = vld [vmem:[#allocation2 + $0x194] ss:$24 sps:$4 sm:$0xff]  }
  0x56   :  { %768 = vmatprep.subr.bf16.mxu0 %v4342_v25  ;;  %848 = vmatprep.subr.bf16.mxu1 %v4393_v39  ;;  %v4438_v25 = vld [vmem:[#allocation2 + $0xd0] ss:$24 sps:$4 sm:$0xff]   ;;  %v4471_v7 = vld [vmem:[#allocation2 + $0x2e0] ss:$24 sps:$4 sm:$0xff]  }
  0x57   :  { %v4492_v35 = vld [vmem:[#allocation4 + $0x40] ss:$16 sps:$4 sm:$0xff]  }
  0x58   :  { %v4498_v39 = vld [vmem:[#allocation4 + $0x60] ss:$16 sps:$4 sm:$0xff]  }
  0x59   :  { %769 = vmatpush1.bf16.msra.mxu0 %v4344_v28  ;;  %849 = vmatpush1.bf16.msra.mxu1 %v4395_v42  ;;  %v4488_v28 = vld [vmem:[#allocation4 + $0x24] ss:$16 sps:$4 sm:$0xff]   ;;  %v4462_v57 = vld [vmem:[#allocation2 + $0x250] ss:$24 sps:$4 sm:$0xff]  }
  0x5a   :  { %770 = vmatprep.subr.bf16.mxu0 %v4345_v29  ;;  %850 = vmatprep.subr.bf16.mxu1 %v4396_v43  ;;  %v4441_v29 = vld [vmem:[#allocation2 + $0x100] ss:$24 sps:$4 sm:$0xff]   ;;  %v4455_v42 = vld [vmem:[#allocation2 + $0x1c4] ss:$24 sps:$4 sm:$0xff]  }
  0x5b   :  { %v4453_v43 = vld [vmem:[#allocation2 + $0x1c0] ss:$24 sps:$4 sm:$0xff]  }
  0x5d   :  { %771 = vmatpush1.bf16.msra.mxu0 %v4347_v32  ;;  %851 = vmatpush1.bf16.msra.mxu1 %v4398_v46  ;;  %v4494_v32 = vld [vmem:[#allocation4 + $0x44] ss:$16 sps:$4 sm:$0xff]  }
  0x5e   :  { %772 = vmatprep.subr.bf16.mxu0 %v4348_v33  ;;  %852 = vmatprep.subr.bf16.mxu1 %v4399_v47  ;;  %v4444_v33 = vld [vmem:[#allocation2 + $0x130] ss:$24 sps:$4 sm:$0xff]   ;;  %v4512_v46 = vld [vmem:[#allocation4 + $0xa4] ss:$16 sps:$4 sm:$0xff]  }
  0x5f   :  { %v4510_v47 = vld [vmem:[#allocation4 + $0xa0] ss:$16 sps:$4 sm:$0xff]  }
  0x61   :  { %773 = vmatpush1.bf16.msra.mxu0 %v4350_v36  ;;  %853 = vmatpush1.bf16.msra.mxu1 %v4401_v50  ;;  %v4500_v36 = vld [vmem:[#allocation4 + $0x64] ss:$16 sps:$4 sm:$0xff]  }
  0x62   :  { %774 = vmatprep.subr.bf16.mxu0 %v4351_v37  ;;  %854 = vmatprep.subr.bf16.mxu1 %v4402_v51  ;;  %v4447_v37 = vld [vmem:[#allocation2 + $0x160] ss:$24 sps:$4 sm:$0xff]   ;;  %v4461_v50 = vld [vmem:[#allocation2 + $0x224] ss:$24 sps:$4 sm:$0xff]  }
  0x63   :  { %v4516_v51 = vld [vmem:[#allocation4 + $0xc0] ss:$16 sps:$4 sm:$0xff]  }
  0x65   :  { %775 = vmatpush1.bf16.msra.mxu0 %v4353_v40  ;;  %855 = vmatpush1.bf16.msra.mxu1 %v4404_v54  ;;  %v4506_v40 = vld [vmem:[#allocation4 + $0x84] ss:$16 sps:$4 sm:$0xff]  }
  0x66   :  { %776 = vmatprep.subr.bf16.mxu0 %v4354_v41  ;;  %856 = vmatprep.subr.bf16.mxu1 %v4405_v55  ;;  %v4450_v41 = vld [vmem:[#allocation2 + $0x190] ss:$24 sps:$4 sm:$0xff]   ;;  %v4464_v54 = vld [vmem:[#allocation2 + $0x254] ss:$24 sps:$4 sm:$0xff]  }
  0x67   :  { %v4522_v55 = vld [vmem:[#allocation4 + $0xe0] ss:$16 sps:$4 sm:$0xff]  }
  0x69   :  { %777 = vmatpush1.bf16.msra.mxu0 %v4356_v44  ;;  %857 = vmatpush1.bf16.msra.mxu1 %v4407_v59  ;;  %v4504_v44 = vld [vmem:[#allocation4 + $0x80] ss:$16 sps:$4 sm:$0xff]  }
  0x6a   :  { %778 = vmatprep.subr.bf16.mxu0 %v4360_v45  ;;  %858 = vmatprep.subr.bf16.mxu1 %v4408_v61  ;;  %v4458_v45 = vld [vmem:[#allocation2 + $0x1f4] ss:$24 sps:$4 sm:$0xff]   ;;  %v4528_v59 = vld [vmem:[#allocation4 + $0x100] ss:$16 sps:$4 sm:$0xff]  }
  0x6b   :  { %v4536_v61 = vld [vmem:[#allocation4 + $0x124] ss:$16 sps:$4 sm:$0xff]  }
  0x6d   :  { %779 = vmatpush1.bf16.msra.mxu0 %v4362_v48  ;;  %859 = vmatpush1.bf16.msra.mxu1 %v4410_v0  ;;  %v4518_v48 = vld [vmem:[#allocation4 + $0xc4] ss:$16 sps:$4 sm:$0xff]   ;;  %v4534_v0 = vld [vmem:[#allocation4 + $0x120] ss:$16 sps:$4 sm:$0xff]  }
  0x6e   :  { %780 = vmatprep.subr.bf16.mxu0 %v4366_v49  ;;  %860 = vmatprep.subr.bf16.mxu1 %v4411_v1  ;;  %v4456_v49 = vld [vmem:[#allocation2 + $0x1f0] ss:$24 sps:$4 sm:$0xff]   ;;  %v4542_v1 = vld [vmem:[#allocation4 + $0x144] ss:$16 sps:$4 sm:$0xff]  }
  0x71   :  { %781 = vmatpush1.bf16.msra.mxu0 %v4368_v52  ;;  %861 = vmatpush1.bf16.msra.mxu1 %v4413_v5  ;;  %v4524_v52 = vld [vmem:[#allocation4 + $0xe4] ss:$16 sps:$4 sm:$0xff]   ;;  %v4540_v5 = vld [vmem:[#allocation4 + $0x140] ss:$16 sps:$4 sm:$0xff]  }
  0x72   :  { %782 = vmatprep.subr.bf16.mxu0 %v4372_v53  ;;  %862 = vmatprep.subr.bf16.mxu1 %v4414_v6  ;;  %v4459_v53 = vld [vmem:[#allocation2 + $0x220] ss:$24 sps:$4 sm:$0xff]   ;;  %v4548_v6 = vld [vmem:[#allocation4 + $0x164] ss:$16 sps:$4 sm:$0xff]  }
  0x75   :  { %783 = vmatpush1.bf16.msra.mxu0 %v4374_v56  ;;  %863 = vmatpush1.bf16.msra.mxu1 %v4416_v8  ;;  %v4530_v56 = vld [vmem:[#allocation4 + $0x104] ss:$16 sps:$4 sm:$0xff]  }
  0x76   :  { %793 = vmatprep.subr.bf16.mxu0 %v4380_v58  ;;  %864 = vmatprep.subr.bf16.mxu1 %v4417_v10  ;;  %v4467_v58 = vld [vmem:[#allocation2 + $0x284] ss:$24 sps:$4 sm:$0xff]   ;;  %v4476_v8 = vld [vmem:[#allocation2 + $0x314] ss:$24 sps:$4 sm:$0xff]   ;;  %v4546_v10 = vld [vmem:[#allocation4 + $0x160] ss:$16 sps:$4 sm:$0xff]  }
  0x78   :  { %785 = vmatmul.mubr.bf16.vlgmr.msra.gmra.mrb[0].mxu0 %v5152_v60 }
  0x79   :  { %794 = vmatpush1.bf16.msra.mxu0 %v4378_v62  ;;  %825 = vmatprep.mubr.bf16.mxu0 %v5075_v3  ;;  %v4465_v62 = vld [vmem:[#allocation2 + $0x280] ss:$24 sps:$4 sm:$0xff]  }
  0x7a   :  { %795 = vmatprep.subr.bf16.mxu0 %v4386_v63  ;;  %865 = vmatpush1.bf16.msra.mxu1 %v4419_v13  ;;  %v4470_v63 = vld [vmem:[#allocation2 + $0x2b4] ss:$24 sps:$4 sm:$0xff]   ;;  %v4479_v13 = vld [vmem:[#allocation2 + $0x344] ss:$24 sps:$4 sm:$0xff]  }
  0x7b   :  { %875 = vmatprep.subr.bf16.mxu1 %v4428_v14  ;;  %v4552_v14 = vld [vmem:[#allocation4 + $0x180] ss:$16 sps:$4 sm:$0xff]  }
  0x7d   :  { %796 = vmatpush1.bf16.msra.mxu0 %v4384_v2  ;;  %867 = vmatmul.mubr.bf16.vlgmr.msra.gmra.mrb[0].mxu1 %v5152_v60  ;;  %v4468_v2 = vld [vmem:[#allocation2 + $0x2b0] ss:$24 sps:$4 sm:$0xff]  }
  0x7e   :  { %916 = vmatprep.subr.bf16.mxu0 %v4422_v4  ;;  %876 = vmatpush1.bf16.msra.mxu1 %v4426_v17  ;;  %v4473_v4 = vld [vmem:[#allocation2 + $0x2e4] ss:$24 sps:$4 sm:$0xff]  }
  0x7f   :  { %907 = vmatprep.mubr.bf16.mxu1 %v5075_v3  ;;  %877 = vmatprep.subr.bf16.mxu1 %v4434_v18  ;;  %v4485_v17 = vld [vmem:[#allocation4 + $0xc] ss:$16 sps:$4 sm:$0xff]   ;;  %v4558_v18 = vld [vmem:[#allocation4 + $0x1a0] ss:$16 sps:$4 sm:$0xff]  }
  0x82   :  { %878 = vmatpush1.bf16.msra.mxu1 %v4432_v21  ;;  %v4489_v21 = vld [vmem:[#allocation4 + $0x28] ss:$16 sps:$4 sm:$0xff]  }
  0x83   :  { %2196 = vmatprep.subr.bf16.mxu1 %v4482_v22  ;;  %v4497_v22 = vld [vmem:[#allocation4 + $0x4c] ss:$16 sps:$4 sm:$0xff]  }
  0x84   :  { %3863 = vmatmul.mubr.msk.bf16.vlgmr.msra.gmra.mrb[0].mxu0 %vm748_vm0, %v5159_v9 }
  0x85   :  { %917 = vmatpush1.bf16.msra.mxu0 %v4420_v11  ;;  %948 = vmatprep.mubr.bf16.mxu0 %v5145_v24  ;;  %v4440_v24 = vld [vmem:[#allocation2 + $0xd4] ss:$24 sps:$4 sm:$0xff]  }
  0x86   :  { %918 = vmatprep.subr.bf16.mxu0 %v4425_v12  ;;  %v4554_v11 = vld [vmem:[#allocation4 + $0x184] ss:$16 sps:$4 sm:$0xff]   ;;  %v4474_v12 = vld [vmem:[#allocation2 + $0x310] ss:$24 sps:$4 sm:$0xff]  }
  0x89   :  { %919 = vmatpush1.bf16.msra.mxu0 %v4423_v15  ;;  %3864 = vmatmul.mubr.msk.bf16.vlgmr.msra.gmra.mrb[0].mxu1 %vm748_vm0, %v5159_v9  ;;  %v4560_v15 = vld [vmem:[#allocation4 + $0x1a4] ss:$16 sps:$4 sm:$0xff]  }
  0x8a   :  { %920 = vmatprep.subr.bf16.mxu0 %v4431_v16  ;;  %2197 = vmatpush1.bf16.msra.mxu1 %v4480_v27  ;;  %v4477_v16 = vld [vmem:[#allocation2 + $0x340] ss:$24 sps:$4 sm:$0xff]   ;;  %v4572_v27 = vld [vmem:[#allocation4 + $0x1e4] ss:$16 sps:$4 sm:$0xff]  }
  0x8b   :  { %2198 = vmatprep.subr.bf16.mxu1 %v4488_v28  ;;  %v4507_v28 = vld [vmem:[#allocation4 + $0x88] ss:$16 sps:$4 sm:$0xff]  }
  0x8d   :  { %921 = vmatpush1.bf16.msra.mxu0 %v4429_v19  ;;  %v4483_v19 = vld [vmem:[#allocation4 + $0x8] ss:$16 sps:$4 sm:$0xff]  }
  0x8e   :  { %922 = vmatprep.subr.bf16.mxu0 %v4437_v20  ;;  %2199 = vmatpush1.bf16.msra.mxu1 %v4486_v31  ;;  %v4491_v20 = vld [vmem:[#allocation4 + $0x2c] ss:$16 sps:$4 sm:$0xff]   ;;  %v4513_v31 = vld [vmem:[#allocation4 + $0xa8] ss:$16 sps:$4 sm:$0xff]  }
  0x8f   :  { %2200 = vmatprep.subr.bf16.mxu1 %v4494_v32  ;;  %v4521_v32 = vld [vmem:[#allocation4 + $0xcc] ss:$16 sps:$4 sm:$0xff]  }
  0x91   :  { %923 = vmatpush1.bf16.msra.mxu0 %v4435_v23  ;;  %v4566_v23 = vld [vmem:[#allocation4 + $0x1c4] ss:$16 sps:$4 sm:$0xff]  }
  0x92   :  { %924 = vmatprep.subr.bf16.mxu0 %v4440_v24  ;;  %2201 = vmatpush1.bf16.msra.mxu1 %v4492_v35  ;;  %v4501_v24 = vld [vmem:[#allocation4 + $0x68] ss:$16 sps:$4 sm:$0xff]  }
  0x93   :  { %2202 = vmatprep.subr.bf16.mxu1 %v4500_v36  ;;  %v4525_v35 = vld [vmem:[#allocation4 + $0xe8] ss:$16 sps:$4 sm:$0xff]   ;;  %v4533_v36 = vld [vmem:[#allocation4 + $0x10c] ss:$16 sps:$4 sm:$0xff]  }
  0x95   :  { %925 = vmatpush1.bf16.msra.mxu0 %v4438_v25  ;;  %v4564_v25 = vld [vmem:[#allocation4 + $0x1c0] ss:$16 sps:$4 sm:$0xff]  }
  0x96   :  { %926 = vmatprep.subr.bf16.mxu0 %v4443_v26  ;;  %2203 = vmatpush1.bf16.msra.mxu1 %v4498_v39  ;;  %v4509_v26 = vld [vmem:[#allocation4 + $0x8c] ss:$16 sps:$4 sm:$0xff]   ;;  %v4537_v39 = vld [vmem:[#allocation4 + $0x128] ss:$16 sps:$4 sm:$0xff]  }
  0x97   :  { %2204 = vmatprep.subr.bf16.mxu1 %v4506_v40  ;;  %v4545_v40 = vld [vmem:[#allocation4 + $0x14c] ss:$16 sps:$4 sm:$0xff]  }
  0x99   :  { %927 = vmatpush1.bf16.msra.mxu0 %v4441_v29  ;;  %v4570_v29 = vld [vmem:[#allocation4 + $0x1e0] ss:$16 sps:$4 sm:$0xff]  }
  0x9a   :  { %928 = vmatprep.subr.bf16.mxu0 %v4446_v30  ;;  %2205 = vmatpush1.bf16.msra.mxu1 %v4504_v44  ;;  %v4578_v30 = vld [vmem:[#allocation4 + $0x204] ss:$16 sps:$4 sm:$0xff]   ;;  %v4557_v44 = vld [vmem:[#allocation4 + $0x18c] ss:$16 sps:$4 sm:$0xff]  }
  0x9b   :  { %2206 = vmatprep.subr.bf16.mxu1 %v4512_v46  ;;  %v4563_v46 = vld [vmem:[#allocation4 + $0x1ac] ss:$16 sps:$4 sm:$0xff]  }
  0x9d   :  { %929 = vmatpush1.bf16.msra.mxu0 %v4444_v33  ;;  %v4519_v33 = vld [vmem:[#allocation4 + $0xc8] ss:$16 sps:$4 sm:$0xff]  }
  0x9e   :  { %930 = vmatprep.subr.bf16.mxu0 %v4449_v34  ;;  %2207 = vmatpush1.bf16.msra.mxu1 %v4510_v47  ;;  %v4527_v34 = vld [vmem:[#allocation4 + $0xec] ss:$16 sps:$4 sm:$0xff]   ;;  %v4561_v47 = vld [vmem:[#allocation4 + $0x1a8] ss:$16 sps:$4 sm:$0xff]  }
  0x9f   :  { %2208 = vmatprep.subr.bf16.mxu1 %v4518_v48  ;;  %v4569_v48 = vld [vmem:[#allocation4 + $0x1cc] ss:$16 sps:$4 sm:$0xff]  }
  0xa1   :  { %931 = vmatpush1.bf16.msra.mxu0 %v4447_v37  ;;  %v4531_v37 = vld [vmem:[#allocation4 + $0x108] ss:$16 sps:$4 sm:$0xff]  }
  0xa2   :  { %932 = vmatprep.subr.bf16.mxu0 %v4452_v38  ;;  %2209 = vmatpush1.bf16.msra.mxu1 %v4516_v51  ;;  %v4539_v38 = vld [vmem:[#allocation4 + $0x12c] ss:$16 sps:$4 sm:$0xff]   ;;  %v4573_v51 = vld [vmem:[#allocation4 + $0x1e8] ss:$16 sps:$4 sm:$0xff]  }
  0xa3   :  { %2210 = vmatprep.subr.bf16.mxu1 %v4524_v52  ;;  %v4581_v52 = vld [vmem:[#allocation4 + $0x20c] ss:$16 sps:$4 sm:$0xff]  }
  0xa5   :  { %933 = vmatpush1.bf16.msra.mxu0 %v4450_v41  ;;  %v4543_v41 = vld [vmem:[#allocation4 + $0x148] ss:$16 sps:$4 sm:$0xff]  }
  0xa6   :  { %934 = vmatprep.subr.bf16.mxu0 %v4455_v42  ;;  %2211 = vmatpush1.bf16.msra.mxu1 %v4522_v55  ;;  %v4551_v42 = vld [vmem:[#allocation4 + $0x16c] ss:$16 sps:$4 sm:$0xff]  }
  0xa7   :  { %2212 = vmatprep.subr.bf16.mxu1 %v4530_v56  ;;  %v5178_v56 = vld [vmem:[%s5232_s4] sm:$0x3f] }
  0xa9   :  { %935 = vmatpush1.bf16.msra.mxu0 %v4453_v43  ;;  %v4549_v43 = vld [vmem:[#allocation4 + $0x168] ss:$16 sps:$4 sm:$0xff]  }
  0xaa   :  { %936 = vmatprep.subr.bf16.mxu0 %v4458_v45  ;;  %2213 = vmatpush1.bf16.msra.mxu1 %v4528_v59  ;;  %v4555_v45 = vld [vmem:[#allocation4 + $0x188] ss:$16 sps:$4 sm:$0xff]  }
  0xab   :  { %2214 = vmatprep.subr.bf16.mxu1 %v4536_v61 }
  0xad   :  { %937 = vmatpush1.bf16.msra.mxu0 %v4456_v49  ;;  %v4567_v49 = vld [vmem:[#allocation4 + $0x1c8] ss:$16 sps:$4 sm:$0xff]  }
  0xae   :  { %938 = vmatprep.subr.bf16.mxu0 %v4461_v50  ;;  %2215 = vmatpush1.bf16.msra.mxu1 %v4534_v0  ;;  %v4575_v50 = vld [vmem:[#allocation4 + $0x1ec] ss:$16 sps:$4 sm:$0xff]  }
  0xaf   :  { %2216 = vmatprep.subr.bf16.mxu1 %v4542_v1 }
  0xb1   :  { %939 = vmatpush1.bf16.msra.mxu0 %v4459_v53  ;;  %v178_v53 = vlaneseq }
  0xb2   :  { %940 = vmatprep.subr.bf16.mxu0 %v4464_v54  ;;  %2217 = vmatpush1.bf16.msra.mxu1 %v4540_v5 }
  0xb3   :  { %2218 = vmatprep.subr.bf16.mxu1 %v4548_v6  ;;  %v5172_v54 = vshrl.u32 %v178_v53, 7  ;;  %v4635_v53 = vld [vmem:[#allocation4 + $0x32c] ss:$16 sps:$4 sm:$0xff]  }
  0xb5   :  { %941 = vmatpush1.bf16.msra.mxu0 %v4462_v57  ;;  %v180_v55 = vsub.s32 0, %v5172_v54  ;;  %v184_v57 = vsub.s32 1, %v5172_v54 }
  0xb6   :  { %942 = vmatprep.subr.bf16.mxu0 %v4467_v58  ;;  %2219 = vmatpush1.bf16.msra.mxu1 %v4546_v10  ;;  %v4576_v10 = vld [vmem:[#allocation4 + $0x200] ss:$16 sps:$4 sm:$0xff]  }
  0xb7   :  { %2220 = vmatprep.subr.bf16.mxu1 %v4554_v11  ;;  %v181_v58 = vrot.slane %v5178_v56, %v180_v55  ;;  %v185_v59 = vrot.slane %v5178_v56, %v184_v57  ;;  %v4579_v11 = vld [vmem:[#allocation4 + $0x208] ss:$16 sps:$4 sm:$0xff]  }
  0xb9   :  { %943 = vmatpush1.bf16.msra.mxu0 %v4465_v62 }
  0xba   :  { %944 = vmatprep.subr.bf16.mxu0 %v4470_v63  ;;  %2221 = vmatpush1.bf16.msra.mxu1 %v4552_v14  ;;  %v4587_v14 = vld [vmem:[#allocation4 + $0x22c] ss:$16 sps:$4 sm:$0xff]  }
  0xbb   :  { %2222 = vmatprep.subr.bf16.mxu1 %v4560_v15  ;;  %v4582_v15 = vld [vmem:[#allocation4 + $0x220] ss:$16 sps:$4 sm:$0xff]  }
  0xbd   :  { %945 = vmatpush1.bf16.msra.mxu0 %v4468_v2 }
  0xbe   :  { %946 = vmatprep.subr.bf16.mxu0 %v4473_v4  ;;  %2223 = vmatpush1.bf16.msra.mxu1 %v4558_v18  ;;  %v4593_v18 = vld [vmem:[#allocation4 + $0x24c] ss:$16 sps:$4 sm:$0xff]  }
  0xbf   :  { %2224 = vmatprep.subr.bf16.mxu1 %v4566_v23 }
  0xc1   :  { %947 = vmatpush1.bf16.msra.mxu0 %v4471_v7 }
  0xc2   :  { %957 = vmatprep.subr.bf16.mxu0 %v4476_v8  ;;  %2225 = vmatpush1.bf16.msra.mxu1 %v4564_v25  ;;  %v4597_v25 = vld [vmem:[#allocation4 + $0x268] ss:$16 sps:$4 sm:$0xff]  }
  0xc3   :  { %2226 = vmatprep.subr.bf16.mxu1 %v4572_v27  ;;  %v4602_v27 = vld [vmem:[#allocation4 + $0x284] ss:$16 sps:$4 sm:$0xff]  }
  0xc4   :  { %949 = vmatmul.mubr.bf16.vlgmr.msra.gmra.mrb[4].mxu0 %v5152_v60  ;;  %v4495_v60 = vld [vmem:[#allocation4 + $0x48] ss:$16 sps:$4 sm:$0xff]  }
  0xc5   :  { %958 = vmatpush1.bf16.msra.mxu0 %v4474_v12  ;;  %989 = vmatprep.mubr.bf16.mxu0 %v5075_v3  ;;  %v4503_v3 = vld [vmem:[#allocation4 + $0x6c] ss:$16 sps:$4 sm:$0xff]  }
  0xc6   :  { %959 = vmatprep.subr.bf16.mxu0 %v4479_v13  ;;  %2227 = vmatpush1.bf16.msra.mxu1 %v4570_v29  ;;  %v4584_v13 = vld [vmem:[#allocation4 + $0x224] ss:$16 sps:$4 sm:$0xff]  }
  0xc7   :  { %2237 = vmatprep.subr.bf16.mxu1 %v4578_v30 }
  0xc9   :  { %960 = vmatpush1.bf16.msra.mxu0 %v4477_v16  ;;  %v4585_v16 = vld [vmem:[#allocation4 + $0x228] ss:$16 sps:$4 sm:$0xff]  }
  0xca   :  { %2319 = vmatprep.subr.bf16.mxu0 %v4485_v17  ;;  %v4590_v17 = vld [vmem:[#allocation4 + $0x244] ss:$16 sps:$4 sm:$0xff]  }
  0xd0   :  { %3865 = vmatmul.mubr.msk.bf16.vlgmr.msra.gmra.mrb[4].mxu0 %vm748_vm0, %v5159_v9  ;;  %v4515_v9 = vld [vmem:[#allocation4 + $0xac] ss:$16 sps:$4 sm:$0xff]  }
  0xd1   :  { %2320 = vmatpush1.bf16.msra.mxu0 %v4483_v19  ;;  %v192_v19 = vsub.s32 3, %v5172_v54 }
  0xd2   :  { %2321 = vmatprep.subr.bf16.mxu0 %v4491_v20  ;;  %v4588_v20 = vld [vmem:[#allocation4 + $0x240] ss:$16 sps:$4 sm:$0xff]  }
  0xd5   :  { %2322 = vmatpush1.bf16.msra.mxu0 %v4489_v21  ;;  %v4591_v21 = vld [vmem:[#allocation4 + $0x248] ss:$16 sps:$4 sm:$0xff]  }
  0xd6   :  { %2323 = vmatprep.subr.bf16.mxu0 %v4497_v22  ;;  %v4596_v22 = vld [vmem:[#allocation4 + $0x264] ss:$16 sps:$4 sm:$0xff]  }
  0xd9   :  { %2324 = vmatpush1.bf16.msra.mxu0 %v4495_v60  ;;  %v4599_v60 = vld [vmem:[#allocation4 + $0x26c] ss:$16 sps:$4 sm:$0xff]  }
  0xda   :  { %2325 = vmatprep.subr.bf16.mxu0 %v4503_v3  ;;  %v193_v3 = vrot.slane %v5178_v56, %v192_v19 }
  0xdd   :  { %2326 = vmatpush1.bf16.msra.mxu0 %v4501_v24  ;;  %v4594_v24 = vld [vmem:[#allocation4 + $0x260] ss:$16 sps:$4 sm:$0xff]  }
  0xde   :  { %2327 = vmatprep.subr.bf16.mxu0 %v4509_v26 }
  0xe1   :  { %2328 = vmatpush1.bf16.msra.mxu0 %v4507_v28  ;;  %v4605_v28 = vld [vmem:[#allocation4 + $0x28c] ss:$16 sps:$4 sm:$0xff]  }
  0xe2   :  { %2329 = vmatprep.subr.bf16.mxu0 %v4515_v9 }
  0xe5   :  { %2330 = vmatpush1.bf16.msra.mxu0 %v4513_v31 }
  0xe6   :  { %2331 = vmatprep.subr.bf16.mxu0 %v4521_v32  ;;  %v4600_v32 = vld [vmem:[#allocation4 + $0x280] ss:$16 sps:$4 sm:$0xff]  }
  0xe9   :  { %2332 = vmatpush1.bf16.msra.mxu0 %v4519_v33  ;;  %v4603_v33 = vld [vmem:[#allocation4 + $0x288] ss:$16 sps:$4 sm:$0xff]  }
  0xea   :  { %2333 = vmatprep.subr.bf16.mxu0 %v4527_v34  ;;  %v4608_v34 = vld [vmem:[#allocation4 + $0x2a4] ss:$16 sps:$4 sm:$0xff]  }
  0xed   :  { %2334 = vmatpush1.bf16.msra.mxu0 %v4525_v35  ;;  %v4611_v35 = vld [vmem:[#allocation4 + $0x2ac] ss:$16 sps:$4 sm:$0xff]  }
  0xee   :  { %2335 = vmatprep.subr.bf16.mxu0 %v4533_v36 }
  0xf1   :  { %2336 = vmatpush1.bf16.msra.mxu0 %v4531_v37 }
  0xf2   :  { %2337 = vmatprep.subr.bf16.mxu0 %v4539_v38  ;;  %v4606_v38 = vld [vmem:[#allocation4 + $0x2a0] ss:$16 sps:$4 sm:$0xff]  }
  0xf5   :  { %2338 = vmatpush1.bf16.msra.mxu0 %v4537_v39  ;;  %v4609_v39 = vld [vmem:[#allocation4 + $0x2a8] ss:$16 sps:$4 sm:$0xff]  }
  0xf6   :  { %2339 = vmatprep.subr.bf16.mxu0 %v4545_v40  ;;  %v4614_v40 = vld [vmem:[#allocation4 + $0x2c4] ss:$16 sps:$4 sm:$0xff]  }
  0xf9   :  { %2340 = vmatpush1.bf16.msra.mxu0 %v4543_v41  ;;  %v4617_v41 = vld [vmem:[#allocation4 + $0x2cc] ss:$16 sps:$4 sm:$0xff]  }
  0xfa   :  { %2341 = vmatprep.subr.bf16.mxu0 %v4551_v42  ;;  %v4612_v42 = vld [vmem:[#allocation4 + $0x2c0] ss:$16 sps:$4 sm:$0xff]  }
  0xfd   :  { %2342 = vmatpush1.bf16.msra.mxu0 %v4549_v43  ;;  %v4615_v43 = vld [vmem:[#allocation4 + $0x2c8] ss:$16 sps:$4 sm:$0xff]  }
  0xfe   :  { %2343 = vmatprep.subr.bf16.mxu0 %v4557_v44  ;;  %v4620_v44 = vld [vmem:[#allocation4 + $0x2e4] ss:$16 sps:$4 sm:$0xff]  }
 0x101   :  { %2344 = vmatpush1.bf16.msra.mxu0 %v4555_v45  ;;  %v4623_v45 = vld [vmem:[#allocation4 + $0x2ec] ss:$16 sps:$4 sm:$0xff]  }
 0x102   :  { %2345 = vmatprep.subr.bf16.mxu0 %v4563_v46  ;;  %v4618_v46 = vld [vmem:[#allocation4 + $0x2e0] ss:$16 sps:$4 sm:$0xff]  }
 0x105   :  { %2346 = vmatpush1.bf16.msra.mxu0 %v4561_v47  ;;  %v4621_v47 = vld [vmem:[#allocation4 + $0x2e8] ss:$16 sps:$4 sm:$0xff]  }
 0x106   :  { %2347 = vmatprep.subr.bf16.mxu0 %v4569_v48  ;;  %v4626_v48 = vld [vmem:[#allocation4 + $0x304] ss:$16 sps:$4 sm:$0xff]  }
 0x109   :  { %2348 = vmatpush1.bf16.msra.mxu0 %v4567_v49  ;;  %v4629_v49 = vld [vmem:[#allocation4 + $0x30c] ss:$16 sps:$4 sm:$0xff]  }
 0x10a   :  { %2349 = vmatprep.subr.bf16.mxu0 %v4575_v50  ;;  %v4624_v50 = vld [vmem:[#allocation4 + $0x300] ss:$16 sps:$4 sm:$0xff]  }
 0x10d   :  { %2350 = vmatpush1.bf16.msra.mxu0 %v4573_v51  ;;  %v4627_v51 = vld [vmem:[#allocation4 + $0x308] ss:$16 sps:$4 sm:$0xff]  }
 0x10e   :  { %2360 = vmatprep.subr.bf16.mxu0 %v4581_v52  ;;  %v4632_v52 = vld [vmem:[#allocation4 + $0x324] ss:$16 sps:$4 sm:$0xff]  }
 0x157   :  { %v827_v61 = vpop.f32.mrb[0].mxu0 }
 0x158   :  { %v4262_v62 = vadd.f32 %v827_v61, %v181_v58  ;;  %v829_v63 = vpop.f32.mrb[1].mxu0  ;;  %v4630_v58 = vld [vmem:[#allocation4 + $0x320] ss:$16 sps:$4 sm:$0xff]   ;;  %v4638_v61 = vld [vmem:[#allocation4 + $0x344] ss:$16 sps:$4 sm:$0xff]  }
 0x159   :  { %v4263_v0 = vadd.f32 %v829_v63, %v185_v59  ;;  %v831_v1 = vpop.f32.mrb[2].mxu0  ;;  %v4633_v59 = vld [vmem:[#allocation4 + $0x328] ss:$16 sps:$4 sm:$0xff]   ;;  %v4636_v63 = vld [vmem:[#allocation4 + $0x340] ss:$16 sps:$4 sm:$0xff]  }
 0x15a   :  { %vm998_vm1 = vcmp.ge.f32.partialorder %v4262_v62, 0.0  ;;  %v1004_v2 = vmul.f32 0.0001, %v4262_v62  ;;  %v832_v4 = vpop.f32.mrb[3].mxu0  ;;  %v4644_v1 = vld [vmem:[#allocation4 + $0x364] ss:$16 sps:$4 sm:$0xff]  }
 0x15b   :  { %vm999_vm2 = vcmp.ge.f32.partialorder %v4263_v0, 0.0  ;;  %v1005_v5 = vmul.f32 0.0001, %v4263_v0  ;;  %v4642_v4 = vld [vmem:[#allocation4 + $0x360] ss:$16 sps:$4 sm:$0xff]  }
 0x15c   :  { %v1010_v6 = vsel %vm998_vm1, %v4262_v62, %v1004_v2  ;;  %v5191_v23 = vpop.f32.mrb[0].mxu1  ;;  %v4641_v62 = vld [vmem:[#allocation4 + $0x34c] ss:$16 sps:$4 sm:$0xff]  }
 0x15d   :  { %v1011_v7 = vsel %vm999_vm2, %v4263_v0, %v1005_v5  ;;  %v1016_v12 = vpack.c.bf16 %v1010_v6, %v1010_v6  ;;  %v911_v26 = vpop.f32.mrb[1].mxu1  ;;  %v4639_v0 = vld [vmem:[#allocation4 + $0x348] ss:$16 sps:$4 sm:$0xff]   ;;  %v4647_v2 = vld [vmem:[#allocation4 + $0x36c] ss:$16 sps:$4 sm:$0xff]  }
 0x15e   :  { %v1017_v8 = vpack.c.bf16 %v1011_v7, %v1011_v7  ;;  %v4265_v29 = vadd.f32 %v911_v26, %v193_v3  ;;  %v913_v9 = vpop.f32.mrb[2].mxu1  ;;  %v4645_v5 = vld [vmem:[#allocation4 + $0x368] ss:$16 sps:$4 sm:$0xff]   ;;  %v4650_v6 = vld [vmem:[#allocation4 + $0x384] ss:$16 sps:$4 sm:$0xff]  }
 0x15f   :  { %v914_v30 = vpop.f32.mrb[3].mxu1  ;;  %v4653_v7 = vld [vmem:[#allocation4 + $0x38c] ss:$16 sps:$4 sm:$0xff]   ;;  %v4669_v26 = vld [vmem:[#allocation4 + $0x3e8] ss:$16 sps:$4 sm:$0xff]  }
 0x160   :  { %2228 = vmatprep.mubr.bf16.mxu1 %v1017_v8  ;;  %2351 = vmatprep.mubr.bf16.mxu0 %v1017_v8  ;;  %vm1001_vm3 = vcmp.ge.f32.partialorder %v4265_v29, 0.0  ;;  %v1007_v31 = vmul.f32 0.0001, %v4265_v29  ;;  %v188_v8 = vsub.s32 2, %v5172_v54  ;;  %v4671_v3 = vld [vmem:[#allocation4 + $0x3ec] ss:$16 sps:$4 sm:$0xff]  }
 0x161   :  { %2229 = vmatmul.mubr.bf16.vlgmr.msra.gmra.mrb[4].mxu1 %v1016_v12  ;;  %2352 = vmatmul.mubr.bf16.vlgmr.msra.gmra.mrb[8].mxu0 %v1016_v12  ;;  %v4656_v12 = vld [vmem:[#allocation4 + $0x3a4] ss:$16 sps:$4 sm:$0xff]   ;;  %v4672_v9 = vld [vmem:[#allocation4 + $0x400] ss:$16 sps:$4 sm:$0xff]   ;;  %v4675_v30 = vld [vmem:[#allocation4 + $0x408] ss:$16 sps:$4 sm:$0xff]  }
 0x162   :  { %2238 = vmatpush1.bf16.msra.mxu1 %v4576_v10  ;;  %2361 = vmatpush1.bf16.msra.mxu0 %v4579_v11  ;;  %v1013_v36 = vsel %vm1001_vm3, %v4265_v29, %v1007_v31  ;;  %v4648_v10 = vld [vmem:[#allocation4 + $0x380] ss:$16 sps:$4 sm:$0xff]   ;;  %v4651_v11 = vld [vmem:[#allocation4 + $0x388] ss:$16 sps:$4 sm:$0xff]  }
 0x163   :  { %2239 = vmatprep.subr.bf16.mxu1 %v4584_v13  ;;  %2362 = vmatprep.subr.bf16.mxu0 %v4587_v14  ;;  %v1019_v37 = vpack.c.bf16 %v1013_v36, %v1013_v36  ;;  %v4659_v13 = vld [vmem:[#allocation4 + $0x3ac] ss:$16 sps:$4 sm:$0xff]   ;;  %v189_v14 = vrot.slane %v5178_v56, %v188_v8  ;;  %v4681_v36 = vld [vmem:[#allocation4 + $0x428] ss:$16 sps:$4 sm:$0xff]  }
 0x165   :  { %2269 = vmatprep.mubr.bf16.mxu1 %v1019_v37  ;;  %2392 = vmatprep.mubr.bf16.mxu0 %v1019_v37  ;;  %v4686_v37 = vld [vmem:[#allocation4 + $0x444] ss:$16 sps:$4 sm:$0xff]  }
 0x166   :  { %2240 = vmatpush1.bf16.msra.mxu1 %v4582_v15  ;;  %2363 = vmatpush1.bf16.msra.mxu0 %v4585_v16  ;;  %v4654_v15 = vld [vmem:[#allocation4 + $0x3a0] ss:$16 sps:$4 sm:$0xff]   ;;  %v4657_v16 = vld [vmem:[#allocation4 + $0x3a8] ss:$16 sps:$4 sm:$0xff]  }
 0x167   :  { %2241 = vmatprep.subr.bf16.mxu1 %v4590_v17  ;;  %2364 = vmatprep.subr.bf16.mxu0 %v4593_v18  ;;  %v4662_v17 = vld [vmem:[#allocation4 + $0x3c4] ss:$16 sps:$4 sm:$0xff]   ;;  %v4665_v18 = vld [vmem:[#allocation4 + $0x3cc] ss:$16 sps:$4 sm:$0xff]  }
 0x16a   :  { %2242 = vmatpush1.bf16.msra.mxu1 %v4588_v20  ;;  %2365 = vmatpush1.bf16.msra.mxu0 %v4591_v21  ;;  %v4264_v20 = vadd.f32 %v5191_v23, %v189_v14  ;;  %v4660_v21 = vld [vmem:[#allocation4 + $0x3c0] ss:$16 sps:$4 sm:$0xff]   ;;  %v200_v23 = vsub.s32 5, %v5172_v54  ;;  %v4725_v14 = vld [vmem:[#allocation4 + $0x50c] ss:$16 sps:$4 sm:$0xff]  }
 0x16b   :  { %2243 = vmatprep.subr.bf16.mxu1 %v4596_v22  ;;  %2366 = vmatprep.subr.bf16.mxu0 %v4599_v60  ;;  %v4663_v22 = vld [vmem:[#allocation4 + $0x3c8] ss:$16 sps:$4 sm:$0xff]   ;;  %v4668_v60 = vld [vmem:[#allocation4 + $0x3e4] ss:$16 sps:$4 sm:$0xff]  }
 0x16c   :  { %vm1000_vm4 = vcmp.ge.f32.partialorder %v4264_v20, 0.0 }
 0x16e   :  { %2244 = vmatpush1.bf16.msra.mxu1 %v4594_v24  ;;  %2367 = vmatpush1.bf16.msra.mxu0 %v4597_v25  ;;  %v1006_v24 = vmul.f32 0.0001, %v4264_v20  ;;  %v4666_v25 = vld [vmem:[#allocation4 + $0x3e0] ss:$16 sps:$4 sm:$0xff]  }
 0x16f   :  { %2245 = vmatprep.subr.bf16.mxu1 %v4602_v27  ;;  %2368 = vmatprep.subr.bf16.mxu0 %v4605_v28  ;;  %v4674_v27 = vld [vmem:[#allocation4 + $0x404] ss:$16 sps:$4 sm:$0xff]   ;;  %v4677_v28 = vld [vmem:[#allocation4 + $0x40c] ss:$16 sps:$4 sm:$0xff]  }
 0x170   :  { %v1012_v29 = vsel %vm1000_vm4, %v4264_v20, %v1006_v24  ;;  %v4726_v20 = vld [vmem:[#allocation4 + $0x520] ss:$16 sps:$4 sm:$0xff]   ;;  %v4735_v24 = vld [vmem:[#allocation4 + $0x548] ss:$16 sps:$4 sm:$0xff]  }
 0x171   :  { %v1018_v31 = vpack.c.bf16 %v1012_v29, %v1012_v29  ;;  %v4746_v29 = vld [vmem:[#allocation4 + $0x584] ss:$16 sps:$4 sm:$0xff]  }
 0x172   :  { %2246 = vmatpush1.bf16.msra.mxu1 %v4600_v32  ;;  %2369 = vmatpush1.bf16.msra.mxu0 %v4603_v33  ;;  %v4680_v32 = vld [vmem:[#allocation4 + $0x424] ss:$16 sps:$4 sm:$0xff]   ;;  %v4683_v33 = vld [vmem:[#allocation4 + $0x42c] ss:$16 sps:$4 sm:$0xff]  }
 0x173   :  { %2247 = vmatprep.subr.bf16.mxu1 %v4608_v34  ;;  %2370 = vmatprep.subr.bf16.mxu0 %v4611_v35  ;;  %v201_v34 = vrot.slane %v5178_v56, %v200_v23  ;;  %v4678_v35 = vld [vmem:[#allocation4 + $0x420] ss:$16 sps:$4 sm:$0xff]   ;;  %v4749_v23 = vld [vmem:[#allocation4 + $0x58c] ss:$16 sps:$4 sm:$0xff]  }
 0x176   :  { %2248 = vmatpush1.bf16.msra.mxu1 %v4606_v38  ;;  %2371 = vmatpush1.bf16.msra.mxu0 %v4609_v39  ;;  %v4689_v38 = vld [vmem:[#allocation4 + $0x44c] ss:$16 sps:$4 sm:$0xff]  }
 0x177   :  { %2249 = vmatprep.subr.bf16.mxu1 %v4614_v40  ;;  %2372 = vmatprep.subr.bf16.mxu0 %v4617_v41  ;;  %v4684_v41 = vld [vmem:[#allocation4 + $0x440] ss:$16 sps:$4 sm:$0xff]  }
 0x17a   :  { %2250 = vmatpush1.bf16.msra.mxu1 %v4612_v42  ;;  %2373 = vmatpush1.bf16.msra.mxu0 %v4615_v43 }
 0x17b   :  { %2251 = vmatprep.subr.bf16.mxu1 %v4620_v44  ;;  %2374 = vmatprep.subr.bf16.mxu0 %v4623_v45  ;;  %v4687_v44 = vld [vmem:[#allocation4 + $0x448] ss:$16 sps:$4 sm:$0xff]   ;;  %v4692_v45 = vld [vmem:[#allocation4 + $0x464] ss:$16 sps:$4 sm:$0xff]  }
 0x17e   :  { %2252 = vmatpush1.bf16.msra.mxu1 %v4618_v46  ;;  %2375 = vmatpush1.bf16.msra.mxu0 %v4621_v47  ;;  %v4695_v47 = vld [vmem:[#allocation4 + $0x46c] ss:$16 sps:$4 sm:$0xff]  }
 0x17f   :  { %2253 = vmatprep.subr.bf16.mxu1 %v4626_v48  ;;  %2376 = vmatprep.subr.bf16.mxu0 %v4629_v49 }
 0x182   :  { %2254 = vmatpush1.bf16.msra.mxu1 %v4624_v50  ;;  %2377 = vmatpush1.bf16.msra.mxu0 %v4627_v51  ;;  %v4690_v50 = vld [vmem:[#allocation4 + $0x460] ss:$16 sps:$4 sm:$0xff]   ;;  %v4693_v51 = vld [vmem:[#allocation4 + $0x468] ss:$16 sps:$4 sm:$0xff]  }
 0x183   :  { %2255 = vmatprep.subr.bf16.mxu1 %v4632_v52  ;;  %2378 = vmatprep.subr.bf16.mxu0 %v4635_v53  ;;  %v4698_v53 = vld [vmem:[#allocation4 + $0x484] ss:$16 sps:$4 sm:$0xff]  }
 0x186   :  { %2256 = vmatpush1.bf16.msra.mxu1 %v4630_v58  ;;  %2379 = vmatpush1.bf16.msra.mxu0 %v4633_v59  ;;  %v4701_v58 = vld [vmem:[#allocation4 + $0x48c] ss:$16 sps:$4 sm:$0xff]   ;;  %v4696_v59 = vld [vmem:[#allocation4 + $0x480] ss:$16 sps:$4 sm:$0xff]  }
 0x187   :  { %2257 = vmatprep.subr.bf16.mxu1 %v4638_v61  ;;  %2380 = vmatprep.subr.bf16.mxu0 %v4641_v62  ;;  %v4699_v61 = vld [vmem:[#allocation4 + $0x488] ss:$16 sps:$4 sm:$0xff]   ;;  %v4704_v62 = vld [vmem:[#allocation4 + $0x4a4] ss:$16 sps:$4 sm:$0xff]  }
 0x18a   :  { %2258 = vmatpush1.bf16.msra.mxu1 %v4636_v63  ;;  %2381 = vmatpush1.bf16.msra.mxu0 %v4639_v0  ;;  %v4707_v63 = vld [vmem:[#allocation4 + $0x4ac] ss:$16 sps:$4 sm:$0xff]   ;;  %v4702_v0 = vld [vmem:[#allocation4 + $0x4a0] ss:$16 sps:$4 sm:$0xff]  }
 0x18b   :  { %2259 = vmatprep.subr.bf16.mxu1 %v4644_v1  ;;  %2382 = vmatprep.subr.bf16.mxu0 %v4647_v2  ;;  %v4705_v1 = vld [vmem:[#allocation4 + $0x4a8] ss:$16 sps:$4 sm:$0xff]   ;;  %v4710_v2 = vld [vmem:[#allocation4 + $0x4c4] ss:$16 sps:$4 sm:$0xff]  }
 0x18e   :  { %2260 = vmatpush1.bf16.msra.mxu1 %v4642_v4  ;;  %2383 = vmatpush1.bf16.msra.mxu0 %v4645_v5  ;;  %v4713_v4 = vld [vmem:[#allocation4 + $0x4cc] ss:$16 sps:$4 sm:$0xff]   ;;  %v4708_v5 = vld [vmem:[#allocation4 + $0x4c0] ss:$16 sps:$4 sm:$0xff]  }
 0x18f   :  { %2261 = vmatprep.subr.bf16.mxu1 %v4650_v6  ;;  %2384 = vmatprep.subr.bf16.mxu0 %v4653_v7  ;;  %v4711_v6 = vld [vmem:[#allocation4 + $0x4c8] ss:$16 sps:$4 sm:$0xff]   ;;  %v4716_v7 = vld [vmem:[#allocation4 + $0x4e4] ss:$16 sps:$4 sm:$0xff]  }
 0x192   :  { %2262 = vmatpush1.bf16.msra.mxu1 %v4648_v10  ;;  %2385 = vmatpush1.bf16.msra.mxu0 %v4651_v11  ;;  %v4719_v10 = vld [vmem:[#allocation4 + $0x4ec] ss:$16 sps:$4 sm:$0xff]   ;;  %v4714_v11 = vld [vmem:[#allocation4 + $0x4e0] ss:$16 sps:$4 sm:$0xff]  }
 0x193   :  { %2263 = vmatprep.subr.bf16.mxu1 %v4656_v12  ;;  %2386 = vmatprep.subr.bf16.mxu0 %v4659_v13  ;;  %v4717_v12 = vld [vmem:[#allocation4 + $0x4e8] ss:$16 sps:$4 sm:$0xff]   ;;  %v4722_v13 = vld [vmem:[#allocation4 + $0x504] ss:$16 sps:$4 sm:$0xff]  }
 0x196   :  { %2264 = vmatpush1.bf16.msra.mxu1 %v4654_v15  ;;  %2387 = vmatpush1.bf16.msra.mxu0 %v4657_v16  ;;  %v4720_v15 = vld [vmem:[#allocation4 + $0x500] ss:$16 sps:$4 sm:$0xff]   ;;  %v4723_v16 = vld [vmem:[#allocation4 + $0x508] ss:$16 sps:$4 sm:$0xff]  }
 0x197   :  { %2265 = vmatprep.subr.bf16.mxu1 %v4662_v17  ;;  %2388 = vmatprep.subr.bf16.mxu0 %v4665_v18  ;;  %v4728_v17 = vld [vmem:[#allocation4 + $0x524] ss:$16 sps:$4 sm:$0xff]   ;;  %v4731_v18 = vld [vmem:[#allocation4 + $0x52c] ss:$16 sps:$4 sm:$0xff]  }
 0x19a   :  { %2266 = vmatpush1.bf16.msra.mxu1 %v4660_v21  ;;  %2389 = vmatpush1.bf16.msra.mxu0 %v4663_v22  ;;  %v4729_v21 = vld [vmem:[#allocation4 + $0x528] ss:$16 sps:$4 sm:$0xff]   ;;  %v4734_v22 = vld [vmem:[#allocation4 + $0x544] ss:$16 sps:$4 sm:$0xff]  }
 0x19b   :  { %2267 = vmatprep.subr.bf16.mxu1 %v4668_v60  ;;  %2390 = vmatprep.subr.bf16.mxu0 %v4671_v3  ;;  %v4737_v60 = vld [vmem:[#allocation4 + $0x54c] ss:$16 sps:$4 sm:$0xff]   ;;  %v4732_v3 = vld [vmem:[#allocation4 + $0x540] ss:$16 sps:$4 sm:$0xff]  }
 0x19e   :  { %2268 = vmatpush1.bf16.msra.mxu1 %v4666_v25  ;;  %2391 = vmatpush1.bf16.msra.mxu0 %v4669_v26  ;;  %v4740_v25 = vld [vmem:[#allocation4 + $0x564] ss:$16 sps:$4 sm:$0xff]   ;;  %v4743_v26 = vld [vmem:[#allocation4 + $0x56c] ss:$16 sps:$4 sm:$0xff]  }
 0x19f   :  { %2278 = vmatprep.subr.bf16.mxu1 %v4674_v27  ;;  %2401 = vmatprep.subr.bf16.mxu0 %v4677_v28  ;;  %v4738_v27 = vld [vmem:[#allocation4 + $0x560] ss:$16 sps:$4 sm:$0xff]   ;;  %v4741_v28 = vld [vmem:[#allocation4 + $0x568] ss:$16 sps:$4 sm:$0xff]  }
 0x1a1   :  { %2270 = vmatmul.mubr.bf16.vlgmr.msra.gmra.mrb[4].mxu1 %v1018_v31  ;;  %2393 = vmatmul.mubr.bf16.vlgmr.msra.gmra.mrb[8].mxu0 %v1018_v31  ;;  %v4747_v31 = vld [vmem:[#allocation4 + $0x588] ss:$16 sps:$4 sm:$0xff]  }
 0x1a2   :  { %2279 = vmatpush1.bf16.msra.mxu1 %v4672_v9  ;;  %2402 = vmatpush1.bf16.msra.mxu0 %v4675_v30  ;;  %v196_v9 = vsub.s32 4, %v5172_v54  ;;  %v4744_v30 = vld [vmem:[#allocation4 + $0x580] ss:$16 sps:$4 sm:$0xff]   ;;  %v4959_v54 = vld [vmem:[#allocation6 + $0x4e4] ss:$20 sps:$4 sm:$0xff]  }
 0x1a3   :  { %2280 = vmatprep.subr.bf16.mxu1 %v4680_v32  ;;  %2403 = vmatprep.subr.bf16.mxu0 %v4683_v33  ;;  %v5200_v39 = vpop.f32.mrb[4].mxu0  ;;  %v4752_v32 = vld [vmem:[#allocation4 + $0x5a4] ss:$16 sps:$4 sm:$0xff]   ;;  %v4755_v33 = vld [vmem:[#allocation4 + $0x5ac] ss:$16 sps:$4 sm:$0xff]  }
 0x1a4   :  { %v993_v40 = vpop.f32.mrb[5].mxu0 }
 0x1a5   :  { %v4267_v42 = vadd.f32 %v993_v40, %v201_v34  ;;  %v995_v43 = vpop.f32.mrb[6].mxu0  ;;  %v197_v34 = vrot.slane %v5178_v56, %v196_v9  ;;  %v4762_v56 = vld [vmem:[#allocation4 + $0x5e0] ss:$16 sps:$4 sm:$0xff]  }
 0x1a6   :  { %2281 = vmatpush1.bf16.msra.mxu1 %v4678_v35  ;;  %2404 = vmatpush1.bf16.msra.mxu0 %v4681_v36  ;;  %v996_v46 = vpop.f32.mrb[7].mxu0  ;;  %v4750_v35 = vld [vmem:[#allocation4 + $0x5a0] ss:$16 sps:$4 sm:$0xff]   ;;  %v4753_v36 = vld [vmem:[#allocation4 + $0x5a8] ss:$16 sps:$4 sm:$0xff]  }
 0x1a7   :  { %2282 = vmatprep.subr.bf16.mxu1 %v4686_v37  ;;  %2405 = vmatprep.subr.bf16.mxu0 %v4689_v38  ;;  %vm1003_vm5 = vcmp.ge.f32.partialorder %v4267_v42, 0.0  ;;  %v1009_v48 = vmul.f32 0.0001, %v4267_v42  ;;  %v4758_v37 = vld [vmem:[#allocation4 + $0x5c4] ss:$16 sps:$4 sm:$0xff]   ;;  %v4266_v40 = vadd.f32 %v5200_v39, %v197_v34 }
 0x1a8   :  { %v4761_v38 = vld [vmem:[#allocation4 + $0x5cc] ss:$16 sps:$4 sm:$0xff]   ;;  %v4764_v43 = vld [vmem:[#allocation4 + $0x5e4] ss:$16 sps:$4 sm:$0xff]   ;;  %v4765_v46 = vld [vmem:[#allocation4 + $0x5e8] ss:$16 sps:$4 sm:$0xff]  }
 0x1a9   :  { %v1015_v49 = vsel %vm1003_vm5, %v4267_v42, %v1009_v48  ;;  %v4759_v42 = vld [vmem:[#allocation4 + $0x5c8] ss:$16 sps:$4 sm:$0xff]   ;;  %vm1002_vm6 = vcmp.ge.f32.partialorder %v4266_v40, 0.0  ;;  %v4773_v48 = vld [vmem:[#allocation6 + $0xc] ss:$20 sps:$4 sm:$0xff]  }
 0x1aa   :  { %2283 = vmatpush1.bf16.msra.mxu1 %v4684_v41  ;;  %2406 = vmatpush1.bf16.msra.mxu0 %v4687_v44  ;;  %v1021_v52 = vpack.c.bf16 %v1015_v49, %v1015_v49  ;;  %v4756_v41 = vld [vmem:[#allocation4 + $0x5c0] ss:$16 sps:$4 sm:$0xff]   ;;  %v4767_v44 = vld [vmem:[#allocation4 + $0x5ec] ss:$16 sps:$4 sm:$0xff]  }
 0x1ab   :  { %2284 = vmatprep.subr.bf16.mxu1 %v4692_v45  ;;  %2407 = vmatprep.subr.bf16.mxu0 %v4695_v47  ;;  %v1008_v45 = vmul.f32 0.0001, %v4266_v40  ;;  %v4770_v47 = vld [vmem:[#allocation6 + $0x4] ss:$20 sps:$4 sm:$0xff]   ;;  %v4768_v39 = vld [vmem:[#allocation6] ss:$20 sps:$4 sm:$0xff]  }
 0x1ac   :  { %2310 = vmatprep.mubr.bf16.mxu1 %v1021_v52  ;;  %2433 = vmatprep.mubr.bf16.mxu0 %v1021_v52  ;;  %v4776_v52 = vld [vmem:[#allocation6 + $0x2c] ss:$20 sps:$4 sm:$0xff]   ;;  %v4825_v9 = vld [vmem:[#allocation6 + $0x170] ss:$20 sps:$4 sm:$0xff]  }
 0x1ad   :  { %v1014_v49 = vsel %vm1002_vm6, %v4266_v40, %v1008_v45  ;;  %v4836_v34 = vld [vmem:[#allocation6 + $0x1bc] ss:$20 sps:$4 sm:$0xff]   ;;  %v4845_v40 = vld [vmem:[#allocation6 + $0x1ec] ss:$20 sps:$4 sm:$0xff]  }
 0x1ae   :  { %2285 = vmatpush1.bf16.msra.mxu1 %v4690_v50  ;;  %2408 = vmatpush1.bf16.msra.mxu0 %v4693_v51  ;;  %v4771_v50 = vld [vmem:[#allocation6 + $0x8] ss:$20 sps:$4 sm:$0xff]   ;;  %v1020_v51 = vpack.c.bf16 %v1014_v49, %v1014_v49  ;;  %v4855_v49 = vld [vmem:[#allocation6 + $0x238] ss:$20 sps:$4 sm:$0xff]  }
 0x1af   :  { %2286 = vmatprep.subr.bf16.mxu1 %v4698_v53  ;;  %2409 = vmatprep.subr.bf16.mxu0 %v4701_v58  ;;  %v4779_v53 = vld [vmem:[#allocation6 + $0x34] ss:$20 sps:$4 sm:$0xff]  }
 0x1b0   :  { %v4774_v58 = vld [vmem:[#allocation6 + $0x28] ss:$20 sps:$4 sm:$0xff]  }
 0x1b1   :  { %v4846_v45 = vld [vmem:[#allocation6 + $0x208] ss:$20 sps:$4 sm:$0xff]  }
 0x1b2   :  { %2287 = vmatpush1.bf16.msra.mxu1 %v4696_v59  ;;  %2410 = vmatpush1.bf16.msra.mxu0 %v4699_v61  ;;  %v4777_v59 = vld [vmem:[#allocation6 + $0x30] ss:$20 sps:$4 sm:$0xff]   ;;  %v4782_v61 = vld [vmem:[#allocation6 + $0x54] ss:$20 sps:$4 sm:$0xff]  }
 0x1b3   :  { %2288 = vmatprep.subr.bf16.mxu1 %v4704_v62  ;;  %2411 = vmatprep.subr.bf16.mxu0 %v4707_v63  ;;  %v4785_v62 = vld [vmem:[#allocation6 + $0x5c] ss:$20 sps:$4 sm:$0xff]  }
 0x1b4   :  { %v4780_v63 = vld [vmem:[#allocation6 + $0x50] ss:$20 sps:$4 sm:$0xff]  }
 0x1b6   :  { %2289 = vmatpush1.bf16.msra.mxu1 %v4702_v0  ;;  %2412 = vmatpush1.bf16.msra.mxu0 %v4705_v1  ;;  %v4783_v0 = vld [vmem:[#allocation6 + $0x58] ss:$20 sps:$4 sm:$0xff]   ;;  %v4788_v1 = vld [vmem:[#allocation6 + $0x7c] ss:$20 sps:$4 sm:$0xff]  }
 0x1b7   :  { %2290 = vmatprep.subr.bf16.mxu1 %v4710_v2  ;;  %2413 = vmatprep.subr.bf16.mxu0 %v4713_v4  ;;  %v4791_v2 = vld [vmem:[#allocation6 + $0x84] ss:$20 sps:$4 sm:$0xff]  }
 0x1b8   :  { %v4786_v4 = vld [vmem:[#allocation6 + $0x78] ss:$20 sps:$4 sm:$0xff]  }
 0x1ba   :  { %2291 = vmatpush1.bf16.msra.mxu1 %v4708_v5  ;;  %2414 = vmatpush1.bf16.msra.mxu0 %v4711_v6  ;;  %v4789_v5 = vld [vmem:[#allocation6 + $0x80] ss:$20 sps:$4 sm:$0xff]   ;;  %v4794_v6 = vld [vmem:[#allocation6 + $0xa4] ss:$20 sps:$4 sm:$0xff]  }
 0x1bb   :  { %2292 = vmatprep.subr.bf16.mxu1 %v4716_v7  ;;  %2415 = vmatprep.subr.bf16.mxu0 %v4719_v10  ;;  %v4797_v7 = vld [vmem:[#allocation6 + $0xac] ss:$20 sps:$4 sm:$0xff]  }
 0x1bc   :  { %v4792_v10 = vld [vmem:[#allocation6 + $0xa0] ss:$20 sps:$4 sm:$0xff]  }
 0x1be   :  { %2293 = vmatpush1.bf16.msra.mxu1 %v4714_v11  ;;  %2416 = vmatpush1.bf16.msra.mxu0 %v4717_v12  ;;  %v4795_v11 = vld [vmem:[#allocation6 + $0xa8] ss:$20 sps:$4 sm:$0xff]   ;;  %v4800_v12 = vld [vmem:[#allocation6 + $0xcc] ss:$20 sps:$4 sm:$0xff]  }
 0x1bf   :  { %2294 = vmatprep.subr.bf16.mxu1 %v4722_v13  ;;  %2417 = vmatprep.subr.bf16.mxu0 %v4725_v14  ;;  %v4803_v13 = vld [vmem:[#allocation6 + $0xd4] ss:$20 sps:$4 sm:$0xff]  }
 0x1c0   :  { %v4798_v14 = vld [vmem:[#allocation6 + $0xc8] ss:$20 sps:$4 sm:$0xff]  }
 0x1c2   :  { %2295 = vmatpush1.bf16.msra.mxu1 %v4720_v15  ;;  %2418 = vmatpush1.bf16.msra.mxu0 %v4723_v16  ;;  %v4801_v15 = vld [vmem:[#allocation6 + $0xd0] ss:$20 sps:$4 sm:$0xff]   ;;  %v4806_v16 = vld [vmem:[#allocation6 + $0xf4] ss:$20 sps:$4 sm:$0xff]  }
 0x1c3   :  { %2296 = vmatprep.subr.bf16.mxu1 %v4728_v17  ;;  %2419 = vmatprep.subr.bf16.mxu0 %v4731_v18  ;;  %v4809_v17 = vld [vmem:[#allocation6 + $0xfc] ss:$20 sps:$4 sm:$0xff]  }
 0x1c4   :  { %v4804_v18 = vld [vmem:[#allocation6 + $0xf0] ss:$20 sps:$4 sm:$0xff]  }
 0x1c6   :  { %2297 = vmatpush1.bf16.msra.mxu1 %v4726_v20  ;;  %2420 = vmatpush1.bf16.msra.mxu0 %v4729_v21  ;;  %v4807_v20 = vld [vmem:[#allocation6 + $0xf8] ss:$20 sps:$4 sm:$0xff]   ;;  %v4812_v21 = vld [vmem:[#allocation6 + $0x11c] ss:$20 sps:$4 sm:$0xff]  }
 0x1c7   :  { %2298 = vmatprep.subr.bf16.mxu1 %v4734_v22  ;;  %2421 = vmatprep.subr.bf16.mxu0 %v4737_v60  ;;  %v4815_v22 = vld [vmem:[#allocation6 + $0x124] ss:$20 sps:$4 sm:$0xff]  }
 0x1c8   :  { %v4810_v60 = vld [vmem:[#allocation6 + $0x118] ss:$20 sps:$4 sm:$0xff]  }
 0x1ca   :  { %2299 = vmatpush1.bf16.msra.mxu1 %v4732_v3  ;;  %2422 = vmatpush1.bf16.msra.mxu0 %v4735_v24  ;;  %v4813_v3 = vld [vmem:[#allocation6 + $0x120] ss:$20 sps:$4 sm:$0xff]   ;;  %v4818_v24 = vld [vmem:[#allocation6 + $0x144] ss:$20 sps:$4 sm:$0xff]  }
 0x1cb   :  { %2300 = vmatprep.subr.bf16.mxu1 %v4740_v25  ;;  %2423 = vmatprep.subr.bf16.mxu0 %v4743_v26  ;;  %v4821_v25 = vld [vmem:[#allocation6 + $0x14c] ss:$20 sps:$4 sm:$0xff]  }
 0x1cc   :  { %v4816_v26 = vld [vmem:[#allocation6 + $0x140] ss:$20 sps:$4 sm:$0xff]  }
 0x1ce   :  { %2301 = vmatpush1.bf16.msra.mxu1 %v4738_v27  ;;  %2424 = vmatpush1.bf16.msra.mxu0 %v4741_v28  ;;  %v4819_v27 = vld [vmem:[#allocation6 + $0x148] ss:$20 sps:$4 sm:$0xff]   ;;  %v4824_v28 = vld [vmem:[#allocation6 + $0x16c] ss:$20 sps:$4 sm:$0xff]  }
 0x1cf   :  { %2302 = vmatprep.subr.bf16.mxu1 %v4746_v29  ;;  %2425 = vmatprep.subr.bf16.mxu0 %v4749_v23  ;;  %v4827_v29 = vld [vmem:[#allocation6 + $0x174] ss:$20 sps:$4 sm:$0xff]  }
 0x1d0   :  { %v4822_v23 = vld [vmem:[#allocation6 + $0x168] ss:$20 sps:$4 sm:$0xff]  }
 0x1d2   :  { %2303 = vmatpush1.bf16.msra.mxu1 %v4744_v30  ;;  %2426 = vmatpush1.bf16.msra.mxu0 %v4747_v31  ;;  %v4830_v30 = vld [vmem:[#allocation6 + $0x194] ss:$20 sps:$4 sm:$0xff]   ;;  %v4833_v31 = vld [vmem:[#allocation6 + $0x19c] ss:$20 sps:$4 sm:$0xff]  }
 0x1d3   :  { %2304 = vmatprep.subr.bf16.mxu1 %v4752_v32  ;;  %2427 = vmatprep.subr.bf16.mxu0 %v4755_v33  ;;  %v4828_v32 = vld [vmem:[#allocation6 + $0x190] ss:$20 sps:$4 sm:$0xff]   ;;  %v4831_v33 = vld [vmem:[#allocation6 + $0x198] ss:$20 sps:$4 sm:$0xff]  }
 0x1d6   :  { %2305 = vmatpush1.bf16.msra.mxu1 %v4750_v35  ;;  %2428 = vmatpush1.bf16.msra.mxu0 %v4753_v36  ;;  %v4839_v35 = vld [vmem:[#allocation6 + $0x1c4] ss:$20 sps:$4 sm:$0xff]  }
 0x1d7   :  { %2306 = vmatprep.subr.bf16.mxu1 %v4758_v37  ;;  %2429 = vmatprep.subr.bf16.mxu0 %v4761_v38  ;;  %v4834_v36 = vld [vmem:[#allocation6 + $0x1b8] ss:$20 sps:$4 sm:$0xff]   ;;  %v4837_v37 = vld [vmem:[#allocation6 + $0x1c0] ss:$20 sps:$4 sm:$0xff]  }
 0x1d8   :  { %v4842_v38 = vld [vmem:[#allocation6 + $0x1e4] ss:$20 sps:$4 sm:$0xff]  }
 0x1da   :  { %2307 = vmatpush1.bf16.msra.mxu1 %v4756_v41  ;;  %2430 = vmatpush1.bf16.msra.mxu0 %v4759_v42  ;;  %v4840_v41 = vld [vmem:[#allocation6 + $0x1e0] ss:$20 sps:$4 sm:$0xff]   ;;  %v4843_v42 = vld [vmem:[#allocation6 + $0x1e8] ss:$20 sps:$4 sm:$0xff]  }
 0x1db   :  { %2308 = vmatprep.subr.bf16.mxu1 %v4764_v43  ;;  %2431 = vmatprep.subr.bf16.mxu0 %v4767_v44  ;;  %v4848_v43 = vld [vmem:[#allocation6 + $0x20c] ss:$20 sps:$4 sm:$0xff]   ;;  %v4851_v44 = vld [vmem:[#allocation6 + $0x214] ss:$20 sps:$4 sm:$0xff]  }
 0x1de   :  { %2309 = vmatpush1.bf16.msra.mxu1 %v4762_v56  ;;  %2432 = vmatpush1.bf16.msra.mxu0 %v4765_v46  ;;  %v4849_v56 = vld [vmem:[#allocation6 + $0x210] ss:$20 sps:$4 sm:$0xff]   ;;  %v4854_v46 = vld [vmem:[#allocation6 + $0x234] ss:$20 sps:$4 sm:$0xff]  }
 0x1df   :  { %3226 = vmatprep.subr.bf16.mxu1 %v4770_v47  ;;  %3308 = vmatprep.subr.bf16.mxu0 %v4773_v48  ;;  %v4857_v47 = vld [vmem:[#allocation6 + $0x23c] ss:$20 sps:$4 sm:$0xff]  }
 0x1e0   :  { %v4852_v48 = vld [vmem:[#allocation6 + $0x230] ss:$20 sps:$4 sm:$0xff]  }
 0x1e1   :  { %2311 = vmatmul.mubr.bf16.vlgmr.msra.gmra.mrb[4].mxu1 %v1020_v51  ;;  %2434 = vmatmul.mubr.bf16.vlgmr.msra.gmra.mrb[8].mxu0 %v1020_v51  ;;  %v4858_v51 = vld [vmem:[#allocation6 + $0x258] ss:$20 sps:$4 sm:$0xff]  }
 0x1e2   :  { %3227 = vmatpush1.bf16.msra.mxu1 %v4768_v39  ;;  %3309 = vmatpush1.bf16.msra.mxu0 %v4771_v50  ;;  %v4860_v39 = vld [vmem:[#allocation6 + $0x25c] ss:$20 sps:$4 sm:$0xff]   ;;  %v4863_v50 = vld [vmem:[#allocation6 + $0x264] ss:$20 sps:$4 sm:$0xff]  }
 0x1e3   :  { %3228 = vmatprep.subr.bf16.mxu1 %v4776_v52  ;;  %3310 = vmatprep.subr.bf16.mxu0 %v4779_v53  ;;  %v4861_v52 = vld [vmem:[#allocation6 + $0x260] ss:$20 sps:$4 sm:$0xff]   ;;  %v4866_v53 = vld [vmem:[#allocation6 + $0x284] ss:$20 sps:$4 sm:$0xff]  }
 0x1e6   :  { %3229 = vmatpush1.bf16.msra.mxu1 %v4774_v58  ;;  %3311 = vmatpush1.bf16.msra.mxu0 %v4777_v59  ;;  %v4869_v58 = vld [vmem:[#allocation6 + $0x28c] ss:$20 sps:$4 sm:$0xff]   ;;  %v5208_v59 = vld [vmem:[%s5232_s4 + $0x6] sm:$0xf] }
 0x1e7   :  { %3230 = vmatprep.subr.bf16.mxu1 %v4782_v61  ;;  %3312 = vmatprep.subr.bf16.mxu0 %v4785_v62  ;;  %v1219_v61 = vrot.slane %v5208_v59, %v180_v55  ;;  %v1223_v62 = vrot.slane %v5208_v59, %v184_v57 }
 0x1ea   :  { %3231 = vmatpush1.bf16.msra.mxu1 %v4780_v63  ;;  %3313 = vmatpush1.bf16.msra.mxu0 %v4783_v0  ;;  %v1231_v63 = vrot.slane %v5208_v59, %v192_v19 }
 0x1eb   :  { %3232 = vmatprep.subr.bf16.mxu1 %v4788_v1  ;;  %3314 = vmatprep.subr.bf16.mxu0 %v4791_v2 }
 0x1ee   :  { %3233 = vmatpush1.bf16.msra.mxu1 %v4786_v4  ;;  %3315 = vmatpush1.bf16.msra.mxu0 %v4789_v5 }
 0x1ef   :  { %3234 = vmatprep.subr.bf16.mxu1 %v4794_v6  ;;  %3316 = vmatprep.subr.bf16.mxu0 %v4797_v7 }
 0x1f2   :  { %3235 = vmatpush1.bf16.msra.mxu1 %v4792_v10  ;;  %3317 = vmatpush1.bf16.msra.mxu0 %v4795_v11 }
 0x1f3   :  { %3236 = vmatprep.subr.bf16.mxu1 %v4800_v12  ;;  %3318 = vmatprep.subr.bf16.mxu0 %v4803_v13 }
 0x1f6   :  { %3237 = vmatpush1.bf16.msra.mxu1 %v4798_v14  ;;  %3319 = vmatpush1.bf16.msra.mxu0 %v4801_v15 }
 0x1f7   :  { %3238 = vmatprep.subr.bf16.mxu1 %v4806_v16  ;;  %3320 = vmatprep.subr.bf16.mxu0 %v4809_v17  ;;  %v4864_v17 = vld [vmem:[#allocation6 + $0x280] ss:$20 sps:$4 sm:$0xff]  }
 0x1fa   :  { %3239 = vmatpush1.bf16.msra.mxu1 %v4804_v18  ;;  %3321 = vmatpush1.bf16.msra.mxu0 %v4807_v20  ;;  %v4867_v18 = vld [vmem:[#allocation6 + $0x288] ss:$20 sps:$4 sm:$0xff]  }
 0x1fb   :  { %3240 = vmatprep.subr.bf16.mxu1 %v4812_v21  ;;  %3322 = vmatprep.subr.bf16.mxu0 %v4815_v22  ;;  %v4872_v22 = vld [vmem:[#allocation6 + $0x2ac] ss:$20 sps:$4 sm:$0xff]  }
 0x1fe   :  { %3241 = vmatpush1.bf16.msra.mxu1 %v4810_v60  ;;  %3323 = vmatpush1.bf16.msra.mxu0 %v4813_v3  ;;  %v4875_v60 = vld [vmem:[#allocation6 + $0x2b4] ss:$20 sps:$4 sm:$0xff]  }
 0x1ff   :  { %3242 = vmatprep.subr.bf16.mxu1 %v4818_v24  ;;  %3324 = vmatprep.subr.bf16.mxu0 %v4821_v25  ;;  %v4870_v24 = vld [vmem:[#allocation6 + $0x2a8] ss:$20 sps:$4 sm:$0xff]   ;;  %v4873_v25 = vld [vmem:[#allocation6 + $0x2b0] ss:$20 sps:$4 sm:$0xff]  }
 0x202   :  { %3243 = vmatpush1.bf16.msra.mxu1 %v4816_v26  ;;  %3325 = vmatpush1.bf16.msra.mxu0 %v4819_v27  ;;  %v4878_v26 = vld [vmem:[#allocation6 + $0x2d4] ss:$20 sps:$4 sm:$0xff]   ;;  %v4881_v27 = vld [vmem:[#allocation6 + $0x2dc] ss:$20 sps:$4 sm:$0xff]  }
 0x203   :  { %3244 = vmatprep.subr.bf16.mxu1 %v4824_v28  ;;  %3326 = vmatprep.subr.bf16.mxu0 %v4827_v29  ;;  %v4876_v28 = vld [vmem:[#allocation6 + $0x2d0] ss:$20 sps:$4 sm:$0xff]   ;;  %v4879_v29 = vld [vmem:[#allocation6 + $0x2d8] ss:$20 sps:$4 sm:$0xff]  }
 0x206   :  { %3245 = vmatpush1.bf16.msra.mxu1 %v4822_v23  ;;  %3327 = vmatpush1.bf16.msra.mxu0 %v4825_v9  ;;  %v4884_v23 = vld [vmem:[#allocation6 + $0x2fc] ss:$20 sps:$4 sm:$0xff]   ;;  %v4887_v9 = vld [vmem:[#allocation6 + $0x304] ss:$20 sps:$4 sm:$0xff]  }
 0x207   :  { %3246 = vmatprep.subr.bf16.mxu1 %v4830_v30  ;;  %3328 = vmatprep.subr.bf16.mxu0 %v4833_v31  ;;  %v4882_v30 = vld [vmem:[#allocation6 + $0x2f8] ss:$20 sps:$4 sm:$0xff]   ;;  %v4885_v31 = vld [vmem:[#allocation6 + $0x300] ss:$20 sps:$4 sm:$0xff]  }
 0x20a   :  { %3247 = vmatpush1.bf16.msra.mxu1 %v4828_v32  ;;  %3329 = vmatpush1.bf16.msra.mxu0 %v4831_v33  ;;  %v4890_v32 = vld [vmem:[#allocation6 + $0x324] ss:$20 sps:$4 sm:$0xff]   ;;  %v4893_v33 = vld [vmem:[#allocation6 + $0x32c] ss:$20 sps:$4 sm:$0xff]  }
 0x20b   :  { %3248 = vmatprep.subr.bf16.mxu1 %v4836_v34  ;;  %3330 = vmatprep.subr.bf16.mxu0 %v4839_v35  ;;  %v4888_v34 = vld [vmem:[#allocation6 + $0x320] ss:$20 sps:$4 sm:$0xff]   ;;  %v4891_v35 = vld [vmem:[#allocation6 + $0x328] ss:$20 sps:$4 sm:$0xff]  }
 0x20e   :  { %3249 = vmatpush1.bf16.msra.mxu1 %v4834_v36  ;;  %3331 = vmatpush1.bf16.msra.mxu0 %v4837_v37  ;;  %v4896_v36 = vld [vmem:[#allocation6 + $0x34c] ss:$20 sps:$4 sm:$0xff]   ;;  %v4899_v37 = vld [vmem:[#allocation6 + $0x354] ss:$20 sps:$4 sm:$0xff]  }
 0x20f   :  { %3250 = vmatprep.subr.bf16.mxu1 %v4842_v38  ;;  %3332 = vmatprep.subr.bf16.mxu0 %v4845_v40  ;;  %v4894_v38 = vld [vmem:[#allocation6 + $0x348] ss:$20 sps:$4 sm:$0xff]   ;;  %v4897_v40 = vld [vmem:[#allocation6 + $0x350] ss:$20 sps:$4 sm:$0xff]  }
 0x212   :  { %3251 = vmatpush1.bf16.msra.mxu1 %v4840_v41  ;;  %3333 = vmatpush1.bf16.msra.mxu0 %v4843_v42  ;;  %v4902_v41 = vld [vmem:[#allocation6 + $0x374] ss:$20 sps:$4 sm:$0xff]   ;;  %v4905_v42 = vld [vmem:[#allocation6 + $0x37c] ss:$20 sps:$4 sm:$0xff]  }
 0x213   :  { %3252 = vmatprep.subr.bf16.mxu1 %v4848_v43  ;;  %3334 = vmatprep.subr.bf16.mxu0 %v4851_v44  ;;  %v4900_v43 = vld [vmem:[#allocation6 + $0x370] ss:$20 sps:$4 sm:$0xff]   ;;  %v4903_v44 = vld [vmem:[#allocation6 + $0x378] ss:$20 sps:$4 sm:$0xff]  }
 0x216   :  { %3253 = vmatpush1.bf16.msra.mxu1 %v4846_v45  ;;  %3335 = vmatpush1.bf16.msra.mxu0 %v4849_v56  ;;  %v4908_v45 = vld [vmem:[#allocation6 + $0x39c] ss:$20 sps:$4 sm:$0xff]   ;;  %v4911_v56 = vld [vmem:[#allocation6 + $0x3a4] ss:$20 sps:$4 sm:$0xff]  }
 0x217   :  { %3254 = vmatprep.subr.bf16.mxu1 %v4854_v46  ;;  %3336 = vmatprep.subr.bf16.mxu0 %v4857_v47  ;;  %v4906_v46 = vld [vmem:[#allocation6 + $0x398] ss:$20 sps:$4 sm:$0xff]   ;;  %v4909_v47 = vld [vmem:[#allocation6 + $0x3a0] ss:$20 sps:$4 sm:$0xff]  }
 0x21a   :  { %3255 = vmatpush1.bf16.msra.mxu1 %v4852_v48  ;;  %3337 = vmatpush1.bf16.msra.mxu0 %v4855_v49  ;;  %v4914_v48 = vld [vmem:[#allocation6 + $0x3c4] ss:$20 sps:$4 sm:$0xff]   ;;  %v4917_v49 = vld [vmem:[#allocation6 + $0x3cc] ss:$20 sps:$4 sm:$0xff]  }
 0x21b   :  { %3256 = vmatprep.subr.bf16.mxu1 %v4860_v39  ;;  %3338 = vmatprep.subr.bf16.mxu0 %v4863_v50  ;;  %v4912_v39 = vld [vmem:[#allocation6 + $0x3c0] ss:$20 sps:$4 sm:$0xff]   ;;  %v4915_v50 = vld [vmem:[#allocation6 + $0x3c8] ss:$20 sps:$4 sm:$0xff]  }
 0x21e   :  { %3257 = vmatpush1.bf16.msra.mxu1 %v4858_v51  ;;  %3339 = vmatpush1.bf16.msra.mxu0 %v4861_v52  ;;  %v4920_v51 = vld [vmem:[#allocation6 + $0x3ec] ss:$20 sps:$4 sm:$0xff]   ;;  %v4923_v52 = vld [vmem:[#allocation6 + $0x3f4] ss:$20 sps:$4 sm:$0xff]  }
 0x21f   :  { %3267 = vmatprep.subr.bf16.mxu1 %v4866_v53  ;;  %3349 = vmatprep.subr.bf16.mxu0 %v4869_v58  ;;  %v4918_v53 = vld [vmem:[#allocation6 + $0x3e8] ss:$20 sps:$4 sm:$0xff]   ;;  %v4921_v58 = vld [vmem:[#allocation6 + $0x3f0] ss:$20 sps:$4 sm:$0xff]  }
 0x2b4   :  { %v2312_v0 = vpop.f32.mrb[4].mxu1  ;;  %v5219_v1 = vpop.f32.mrb[8].mxu0 }
 0x2b5   :  { %v4268_v2 = vadd.f32 %v2312_v0, %v1219_v61  ;;  %v2314_v4 = vpop.f32.mrb[5].mxu1  ;;  %v2437_v5 = vpop.f32.mrb[9].mxu0  ;;  %v4926_v61 = vld [vmem:[#allocation6 + $0x414] ss:$20 sps:$4 sm:$0xff]   ;;  %v4927_v0 = vld [vmem:[#allocation6 + $0x418] ss:$20 sps:$4 sm:$0xff]  }
 0x2b6   :  { %v4269_v6 = vadd.f32 %v2314_v4, %v1223_v62  ;;  %v4271_v7 = vadd.f32 %v2437_v5, %v1231_v63  ;;  %v2316_v10 = vpop.f32.mrb[6].mxu1  ;;  %v2439_v11 = vpop.f32.mrb[10].mxu0  ;;  %v4929_v62 = vld [vmem:[#allocation6 + $0x41c] ss:$20 sps:$4 sm:$0xff]   ;;  %v4935_v4 = vld [vmem:[#allocation6 + $0x444] ss:$20 sps:$4 sm:$0xff]  }
 0x2b7   :  { %vm2442_vm7 = vcmp.ge.f32.partialorder %v4268_v2, 0.0  ;;  %v2446_v55 = vmul.f32 0.01, %v4268_v2  ;;  %v2317_v14 = vpop.f32.mrb[7].mxu1  ;;  %v2440_v15 = vpop.f32.mrb[11].mxu0 }
 0x2b8   :  { %vm2443_vm8 = vcmp.ge.f32.partialorder %v4269_v6, 0.0  ;;  %v2447_v12 = vmul.f32 0.01, %v4269_v6  ;;  %vm2445_vm9 = vcmp.ge.f32.partialorder %v4271_v7, 0.0  ;;  %v2449_v57 = vmul.f32 0.01, %v4271_v7 }
 0x2b9   :  { %v2450_v13 = vsel %vm2442_vm7, %v4268_v2, %v2446_v55  ;;  %v4924_v63 = vld [vmem:[#allocation6 + $0x410] ss:$20 sps:$4 sm:$0xff]   ;;  %v4930_v5 = vld [vmem:[#allocation6 + $0x438] ss:$20 sps:$4 sm:$0xff]   ;;  %v4936_v11 = vld [vmem:[#allocation6 + $0x460] ss:$20 sps:$4 sm:$0xff]  }
 0x2ba   :  { %v2451_v19 = vsel %vm2443_vm8, %v4269_v6, %v2447_v12  ;;  %v2453_v20 = vsel %vm2445_vm9, %v4271_v7, %v2449_v57  ;;  %v2454_v21 = vpack.c.bf16 %v2450_v13, %v2450_v13  ;;  %v4932_v2 = vld [vmem:[#allocation6 + $0x43c] ss:$20 sps:$4 sm:$0xff]   ;;  %v4933_v6 = vld [vmem:[#allocation6 + $0x440] ss:$20 sps:$4 sm:$0xff]   ;;  %v4938_v7 = vld [vmem:[#allocation6 + $0x464] ss:$20 sps:$4 sm:$0xff]   ;;  %v1227_v13 = vrot.slane %v5208_v59, %v188_v8 }
 0x2bb   :  { %v2455_v16 = vpack.c.bf16 %v2451_v19, %v2451_v19  ;;  %v2457_v3 = vpack.c.bf16 %v2453_v20, %v2453_v20  ;;  %v4941_v10 = vld [vmem:[#allocation6 + $0x46c] ss:$20 sps:$4 sm:$0xff]   ;;  %v4939_v55 = vld [vmem:[#allocation6 + $0x468] ss:$20 sps:$4 sm:$0xff]   ;;  %v4945_v15 = vld [vmem:[#allocation6 + $0x490] ss:$20 sps:$4 sm:$0xff]  }
 0x2bc   :  { %v4944_v12 = vld [vmem:[#allocation6 + $0x48c] ss:$20 sps:$4 sm:$0xff]   ;;  %v4947_v57 = vld [vmem:[#allocation6 + $0x494] ss:$20 sps:$4 sm:$0xff]  }
 0x2bd   :  { %3258 = vmatprep.mubr.bf16.mxu1 %v2455_v16  ;;  %3340 = vmatprep.mubr.bf16.mxu0 %v2455_v16  ;;  %v4942_v14 = vld [vmem:[#allocation6 + $0x488] ss:$20 sps:$4 sm:$0xff]   ;;  %v4951_v20 = vld [vmem:[#allocation6 + $0x4b8] ss:$20 sps:$4 sm:$0xff]   ;;  %v4957_v59 = vld [vmem:[#allocation6 + $0x4e0] ss:$20 sps:$4 sm:$0xff]  }
 0x2be   :  { %3259 = vmatmul.mubr.bf16.vlgmr.msra.gmra.mrb[8].mxu1 %v2454_v21  ;;  %3341 = vmatmul.mubr.bf16.vlgmr.msra.gmra.mrb[12].mxu0 %v2454_v21  ;;  %v4950_v19 = vld [vmem:[#allocation6 + $0x4b4] ss:$20 sps:$4 sm:$0xff]   ;;  %v4953_v16 = vld [vmem:[#allocation6 + $0x4bc] ss:$20 sps:$4 sm:$0xff]   ;;  %v4954_v8 = vld [vmem:[#allocation6 + $0x4d8] ss:$20 sps:$4 sm:$0xff]  }
 0x2bf   :  { %3268 = vmatpush1.bf16.msra.mxu1 %v4864_v17  ;;  %3350 = vmatpush1.bf16.msra.mxu0 %v4867_v18  ;;  %v4270_v17 = vadd.f32 %v5219_v1, %v1227_v13  ;;  %v4948_v18 = vld [vmem:[#allocation6 + $0x4b0] ss:$20 sps:$4 sm:$0xff]   ;;  %v4991_v13 = vld [vmem:[#allocation6 + $0x3a8] ss:$20 sps:$4 sm:$0xff]  }
 0x2c0   :  { %3299 = vmatprep.mubr.bf16.mxu1 %v2457_v3  ;;  %3381 = vmatprep.mubr.bf16.mxu0 %v2457_v3  ;;  %v4956_v21 = vld [vmem:[#allocation6 + $0x4dc] ss:$20 sps:$4 sm:$0xff]  }
 0x2c1   :  { %3269 = vmatprep.subr.bf16.mxu1 %v4872_v22  ;;  %3351 = vmatprep.subr.bf16.mxu0 %v4875_v60  ;;  %v2448_v22 = vmul.f32 0.01, %v4270_v17  ;;  %vm2444_vm10 = vcmp.ge.f32.partialorder %v4270_v17, 0.0  ;;  %v4960_v60 = vld [vmem:[#allocation6 + $0x150] ss:$20 sps:$4 sm:$0xff]  }
 0x2c2   :  { %v4961_v1 = vld [vmem:[#allocation6 + $0x10] ss:$20 sps:$4 sm:$0xff]  }
 0x2c3   :  { %3270 = vmatpush1.bf16.msra.mxu1 %v4870_v24  ;;  %3352 = vmatpush1.bf16.msra.mxu0 %v4873_v25  ;;  %v2452_v3 = vsel %vm2444_vm10, %v4270_v17, %v2448_v22  ;;  %v4962_v25 = vld [vmem:[#allocation6 + $0x178] ss:$20 sps:$4 sm:$0xff]  }
 0x2c4   :  { %3271 = vmatprep.subr.bf16.mxu1 %v4878_v26  ;;  %3353 = vmatprep.subr.bf16.mxu0 %v4881_v27  ;;  %v2456_v24 = vpack.c.bf16 %v2452_v3, %v2452_v3  ;;  %v4963_v26 = vld [vmem:[#allocation6 + $0x38] ss:$20 sps:$4 sm:$0xff]   ;;  %v4964_v27 = vld [vmem:[#allocation6 + $0x1a0] ss:$20 sps:$4 sm:$0xff]  }
 0x2c7   :  { %3272 = vmatpush1.bf16.msra.mxu1 %v4876_v28  ;;  %3354 = vmatpush1.bf16.msra.mxu0 %v4879_v29  ;;  %v4965_v28 = vld [vmem:[#allocation6 + $0x60] ss:$20 sps:$4 sm:$0xff]   ;;  %v4966_v29 = vld [vmem:[#allocation6 + $0x1c8] ss:$20 sps:$4 sm:$0xff]  }
 0x2c8   :  { %3273 = vmatprep.subr.bf16.mxu1 %v4884_v23  ;;  %3355 = vmatprep.subr.bf16.mxu0 %v4887_v9  ;;  %v4967_v23 = vld [vmem:[#allocation6 + $0x88] ss:$20 sps:$4 sm:$0xff]   ;;  %v4968_v9 = vld [vmem:[#allocation6 + $0x1f0] ss:$20 sps:$4 sm:$0xff]  }
 0x2cb   :  { %3274 = vmatpush1.bf16.msra.mxu1 %v4882_v30  ;;  %3356 = vmatpush1.bf16.msra.mxu0 %v4885_v31  ;;  %v4969_v30 = vld [vmem:[#allocation6 + $0xb0] ss:$20 sps:$4 sm:$0xff]   ;;  %v4970_v31 = vld [vmem:[#allocation6 + $0x218] ss:$20 sps:$4 sm:$0xff]  }
 0x2cc   :  { %3275 = vmatprep.subr.bf16.mxu1 %v4890_v32  ;;  %3357 = vmatprep.subr.bf16.mxu0 %v4893_v33  ;;  %v4971_v32 = vld [vmem:[#allocation6 + $0xd8] ss:$20 sps:$4 sm:$0xff]   ;;  %v4972_v33 = vld [vmem:[#allocation6 + $0x240] ss:$20 sps:$4 sm:$0xff]  }
 0x2cf   :  { %3276 = vmatpush1.bf16.msra.mxu1 %v4888_v34  ;;  %3358 = vmatpush1.bf16.msra.mxu0 %v4891_v35  ;;  %v4973_v34 = vld [vmem:[#allocation6 + $0x100] ss:$20 sps:$4 sm:$0xff]   ;;  %v4974_v35 = vld [vmem:[#allocation6 + $0x268] ss:$20 sps:$4 sm:$0xff]  }
 0x2d0   :  { %3277 = vmatprep.subr.bf16.mxu1 %v4896_v36  ;;  %3359 = vmatprep.subr.bf16.mxu0 %v4899_v37  ;;  %v4975_v36 = vld [vmem:[#allocation6 + $0x128] ss:$20 sps:$4 sm:$0xff]   ;;  %v4976_v37 = vld [vmem:[#allocation6 + $0x3d0] ss:$20 sps:$4 sm:$0xff]  }
 0x2d3   :  { %3278 = vmatpush1.bf16.msra.mxu1 %v4894_v38  ;;  %3360 = vmatpush1.bf16.msra.mxu0 %v4897_v40 }
 0x2d4   :  { %3279 = vmatprep.subr.bf16.mxu1 %v4902_v41  ;;  %3361 = vmatprep.subr.bf16.mxu0 %v4905_v42 }
 0x2d7   :  { %3280 = vmatpush1.bf16.msra.mxu1 %v4900_v43  ;;  %3362 = vmatpush1.bf16.msra.mxu0 %v4903_v44 }
 0x2d8   :  { %3281 = vmatprep.subr.bf16.mxu1 %v4908_v45  ;;  %3363 = vmatprep.subr.bf16.mxu0 %v4911_v56 }
 0x2db   :  { %3282 = vmatpush1.bf16.msra.mxu1 %v4906_v46  ;;  %3364 = vmatpush1.bf16.msra.mxu0 %v4909_v47 }
 0x2dc   :  { %3283 = vmatprep.subr.bf16.mxu1 %v4914_v48  ;;  %3365 = vmatprep.subr.bf16.mxu0 %v4917_v49 }
 0x2df   :  { %3284 = vmatpush1.bf16.msra.mxu1 %v4912_v39  ;;  %3366 = vmatpush1.bf16.msra.mxu0 %v4915_v50 }
 0x2e0   :  { %3285 = vmatprep.subr.bf16.mxu1 %v4920_v51  ;;  %3367 = vmatprep.subr.bf16.mxu0 %v4923_v52  ;;  %v4977_v52 = vld [vmem:[#allocation6 + $0x290] ss:$20 sps:$4 sm:$0xff]  }
 0x2e3   :  { %3286 = vmatpush1.bf16.msra.mxu1 %v4918_v53  ;;  %3368 = vmatpush1.bf16.msra.mxu0 %v4921_v58  ;;  %v4978_v58 = vld [vmem:[#allocation6 + $0x3f8] ss:$20 sps:$4 sm:$0xff]  }
 0x2e4   :  { %3287 = vmatprep.subr.bf16.mxu1 %v4926_v61  ;;  %3369 = vmatprep.subr.bf16.mxu0 %v4929_v62  ;;  %v4979_v62 = vld [vmem:[#allocation6 + $0x2b8] ss:$20 sps:$4 sm:$0xff]  }
 0x2e7   :  { %3288 = vmatpush1.bf16.msra.mxu1 %v4924_v63  ;;  %3370 = vmatpush1.bf16.msra.mxu0 %v4927_v0  ;;  %v4980_v63 = vld [vmem:[#allocation6 + $0x420] ss:$20 sps:$4 sm:$0xff]  }
 0x2e8   :  { %3289 = vmatprep.subr.bf16.mxu1 %v4932_v2  ;;  %3371 = vmatprep.subr.bf16.mxu0 %v4935_v4  ;;  %v4981_v0 = vld [vmem:[#allocation6 + $0x2e0] ss:$20 sps:$4 sm:$0xff]   ;;  %v4982_v2 = vld [vmem:[#allocation6 + $0x448] ss:$20 sps:$4 sm:$0xff]  }
 0x2e9   :  { %v4983_v4 = vld [vmem:[#allocation6 + $0x308] ss:$20 sps:$4 sm:$0xff]  }
 0x2eb   :  { %3290 = vmatpush1.bf16.msra.mxu1 %v4930_v5  ;;  %3372 = vmatpush1.bf16.msra.mxu0 %v4933_v6  ;;  %v4984_v5 = vld [vmem:[#allocation6 + $0x470] ss:$20 sps:$4 sm:$0xff]  }
 0x2ec   :  { %3291 = vmatprep.subr.bf16.mxu1 %v4938_v7  ;;  %3373 = vmatprep.subr.bf16.mxu0 %v4941_v10  ;;  %v4985_v6 = vld [vmem:[#allocation6 + $0x330] ss:$20 sps:$4 sm:$0xff]   ;;  %v4986_v7 = vld [vmem:[#allocation6 + $0x498] ss:$20 sps:$4 sm:$0xff]  }
 0x2ed   :  { %v4987_v10 = vld [vmem:[#allocation6 + $0x358] ss:$20 sps:$4 sm:$0xff]  }
 0x2ef   :  { %3292 = vmatpush1.bf16.msra.mxu1 %v4936_v11  ;;  %3374 = vmatpush1.bf16.msra.mxu0 %v4939_v55  ;;  %v4988_v11 = vld [vmem:[#allocation6 + $0x4c0] ss:$20 sps:$4 sm:$0xff]  }
 0x2f0   :  { %3293 = vmatprep.subr.bf16.mxu1 %v4944_v12  ;;  %3375 = vmatprep.subr.bf16.mxu0 %v4947_v57  ;;  %v4989_v55 = vld [vmem:[#allocation6 + $0x380] ss:$20 sps:$4 sm:$0xff]   ;;  %v4990_v12 = vld [vmem:[#allocation6 + $0x4e8] ss:$20 sps:$4 sm:$0xff]  }
 0x2f3   :  { %3294 = vmatpush1.bf16.msra.mxu1 %v4942_v14  ;;  %3376 = vmatpush1.bf16.msra.mxu0 %v4945_v15 }
 0x2f4   :  { %3295 = vmatprep.subr.bf16.mxu1 %v4950_v19  ;;  %3377 = vmatprep.subr.bf16.mxu0 %v4953_v16 }
 0x2f7   :  { %3296 = vmatpush1.bf16.msra.mxu1 %v4948_v18  ;;  %3378 = vmatpush1.bf16.msra.mxu0 %v4951_v20 }
 0x2f8   :  { %3297 = vmatprep.subr.bf16.mxu1 %v4956_v21  ;;  %3379 = vmatprep.subr.bf16.mxu0 %v4959_v54 }
 0x2fb   :  { %3298 = vmatpush1.bf16.msra.mxu1 %v4954_v8  ;;  %3380 = vmatpush1.bf16.msra.mxu0 %v4957_v59 }
 0x2fc   :  { %4218 = vmatprep.subr.bf16.mxu1 %v4960_v60 }
 0x2fe   :  { %3300 = vmatmul.mubr.bf16.vlgmr.msra.gmra.mrb[8].mxu1 %v2456_v24  ;;  %3382 = vmatmul.mubr.bf16.vlgmr.msra.gmra.mrb[12].mxu0 %v2456_v24 }
 0x2ff   :  { %4219 = vmatpush3.bf16.msra.mxu1 %v4961_v1 }
 0x300   :  { %4220 = vmatprep.subr.bf16.mxu1 %v4962_v25 }
 0x303   :  { %4221 = vmatpush3.bf16.msra.mxu1 %v4963_v26 }
 0x304   :  { %4222 = vmatprep.subr.bf16.mxu1 %v4964_v27 }
 0x307   :  { %4223 = vmatpush3.bf16.msra.mxu1 %v4965_v28 }
 0x308   :  { %4224 = vmatprep.subr.bf16.mxu1 %v4966_v29 }
 0x30b   :  { %4225 = vmatpush3.bf16.msra.mxu1 %v4967_v23 }
 0x30c   :  { %4226 = vmatprep.subr.bf16.mxu1 %v4968_v9 }
 0x30f   :  { %4227 = vmatpush3.bf16.msra.mxu1 %v4969_v30 }
 0x310   :  { %4228 = vmatprep.subr.bf16.mxu1 %v4970_v31 }
 0x313   :  { %4229 = vmatpush3.bf16.msra.mxu1 %v4971_v32 }
 0x314   :  { %4230 = vmatprep.subr.bf16.mxu1 %v4972_v33 }
 0x317   :  { %4231 = vmatpush3.bf16.msra.mxu1 %v4973_v34 }
 0x318   :  { %4232 = vmatprep.subr.bf16.mxu1 %v4974_v35 }
 0x31b   :  { %4233 = vmatpush3.bf16.msra.mxu1 %v4975_v36 }
 0x31c   :  { %4240 = vmatprep.subr.bf16.mxu1 %v4976_v37 }
 0x3d1   :  { %v3301_v38 = vpop.f32.mrb[8].mxu1  ;;  %v3383_v40 = vpop.f32.mrb[12].mxu0 }
 0x3d2   :  { %vm3390_vm11 = vcmp.ge.f32.partialorder %v3301_v38, 0.0  ;;  %v3394_v41 = vmul.f32 0.01, %v3301_v38  ;;  %v3303_v42 = vpop.f32.mrb[9].mxu1  ;;  %v3385_v43 = vpop.f32.mrb[13].mxu0  ;;  %vm3392_vm14 = vcmp.ge.f32.partialorder %v3383_v40, 0.0 }
 0x3d3   :  { %vm3391_vm12 = vcmp.ge.f32.partialorder %v3303_v42, 0.0  ;;  %v3395_v44 = vmul.f32 0.01, %v3303_v42  ;;  %v3305_v45 = vpop.f32.mrb[10].mxu1  ;;  %v3387_v56 = vpop.f32.mrb[14].mxu0  ;;  %vm3393_vm13 = vcmp.ge.f32.partialorder %v3385_v43, 0.0 }
 0x3d4   :  { %v3398_v46 = vsel %vm3390_vm11, %v3301_v38, %v3394_v41  ;;  %v3397_v47 = vmul.f32 0.01, %v3385_v43  ;;  %v3306_v48 = vpop.f32.mrb[11].mxu1  ;;  %v3388_v49 = vpop.f32.mrb[15].mxu0  ;;  %v3396_v57 = vmul.f32 0.01, %v3383_v40 }
 0x3d5   :  { %v3399_v39 = vsel %vm3391_vm12, %v3303_v42, %v3395_v44  ;;  %v3402_v53 = vpack.c.bf16 %v3398_v46, %v3398_v46 }
 0x3d6   :  { %v3403_v50 = vpack.c.bf16 %v3399_v39, %v3399_v39  ;;  %v3401_v51 = vsel %vm3393_vm13, %v3385_v43, %v3397_v47  ;;  %v3400_v14 = vsel %vm3392_vm14, %v3383_v40, %v3396_v57 }
 0x3d7   :  { %v3405_v61 = vpack.c.bf16 %v3401_v51, %v3401_v51  ;;  %v3404_v15 = vpack.c.bf16 %v3400_v14, %v3400_v14 }
 0x3d8   :  { %3694 = vmatprep.mubr.bf16.mxu1 %v3403_v50 }
 0x3d9   :  { %3695 = vmatmul.mubr.bf16.vlgmr.msra.gmra.mrb[12].mxu1 %v3402_v53 }
 0x3da   :  { %4241 = vmatpush3.bf16.msra.mxu1 %v4977_v52  ;;  %3734 = vmatprep.mubr.bf16.mxu1 %v3405_v61 }
 0x3db   :  { %4242 = vmatprep.subr.bf16.mxu1 %v4978_v58 }
 0x3de   :  { %4243 = vmatpush3.bf16.msra.mxu1 %v4979_v62 }
 0x3df   :  { %4244 = vmatprep.subr.bf16.mxu1 %v4980_v63 }
 0x3e2   :  { %4245 = vmatpush3.bf16.msra.mxu1 %v4981_v0 }
 0x3e3   :  { %4246 = vmatprep.subr.bf16.mxu1 %v4982_v2 }
 0x3e6   :  { %4247 = vmatpush3.bf16.msra.mxu1 %v4983_v4 }
 0x3e7   :  { %4248 = vmatprep.subr.bf16.mxu1 %v4984_v5 }
 0x3ea   :  { %4249 = vmatpush3.bf16.msra.mxu1 %v4985_v6 }
 0x3eb   :  { %4250 = vmatprep.subr.bf16.mxu1 %v4986_v7 }
 0x3ee   :  { %4251 = vmatpush3.bf16.msra.mxu1 %v4987_v10 }
 0x3ef   :  { %4252 = vmatprep.subr.bf16.mxu1 %v4988_v11 }
 0x3f2   :  { %4253 = vmatpush3.bf16.msra.mxu1 %v4989_v55 }
 0x3f3   :  { %4254 = vmatprep.subr.bf16.mxu1 %v4990_v12 }
 0x3f6   :  { %4255 = vmatpush3.bf16.msra.mxu1 %v4991_v13 }
 0x3f9   :  { %3735 = vmatmul.mubr.bf16.vlgmr.msra.gmra.mrb[16].mxu1 %v3404_v15 }
 0x4ac   :  { %v4234_v19 = vpop.f32.mrb[12].mxu1 }
 0x4ad   :  { %v4235_v16 = vpop.f32.mrb[13].mxu1 }
 0x4ae   :  { %v4236_v17 = vadd.f32 %v4235_v16, %v4234_v19  ;;  %v4237_v18 = vpop.f32.mrb[14].mxu1 }
 0x4af   :  { %v4238_v20 = vpop.f32.mrb[15].mxu1 }
 0x4cc   :  { %v4256_v21 = vpop.f32.mrb[16].mxu1 }
 0x4cd   :  { %v4257_v54 = vpop.f32.mrb[17].mxu1 }
 0x4ce   :  { %v4258_v22 = vadd.f32 %v4257_v54, %v4256_v21  ;;  %v4259_v8 = vpop.f32.mrb[18].mxu1 }
 0x4cf   :  { %v4260_v59 = vpop.f32.mrb[19].mxu1 }
 0x4d0   :  { %v3737_v60 = vadd.f32 %v4258_v22, %v4236_v17 }
 0x4d2   :  { %v3742_v3 = vsub.f32 0.0, %v3737_v60 }
 0x4d4   :  { %v3743_v1 = vmul.f32 1.442695, %v3742_v3 }
 0x4d6   :  { %4992 = vpow2.f32 %v3743_v1 }
 0x4e0   :  { %v4993_v24 = vpop.eup %4992 }
 0x4e1   :  { %v3745_v25 = vadd.f32 1.0, %v4993_v24 }
 0x4e3   :  { %4994 = vrcp.f32 %v3745_v25 }
 0x4ed   :  { %v4995_v26 = vpop.eup %4994 }
 0x4ee   :  { %3748 = vst [vmem:[%s5233_s5] sm:$0xff] %v4995_v26 }
 0x4ef   :  { %3753 = vsyncpa [#allocation3], 1 }
 0x4f0   :  { %3754 = vsyncpa [#allocation5], 1 }

</bundles_post_ra>
